<compile_context>
chip_gen: v5e
topology: v5e:2x2
jax: 0.10.0
libtpu: 0.0.40
codegen_flags: <defaults>
</compile_context>

<pallas_src>
import jax
import jax.numpy as jnp
from jax import lax
from jax.experimental import pallas as pl
from jax.experimental.pallas import tpu as pltpu


# -------------------- Kernel A: conv1 + conv2 + 2x2 maxpool --------------------

def _conv_kernel(xg_ref, w1_ref, b1_ref, w2_ref, b2_ref, sel_ref, o_ref):
    xg = xg_ref[0]                                               # (144, 81) bf16

    # conv1 + ReLU as one MXU matmul against block-diagonal conv1 weights.
    c1 = jnp.dot(xg, w1_ref[...], preferred_element_type=jnp.float32)   # (144, 288) f32
    patches = jnp.maximum(c1 + b1_ref[...], 0.0).astype(jnp.bfloat16)   # relu(conv1) patches

    # conv2 + bias + ReLU as one whole-image matmul (M=144, K=288, N=64).
    y2 = jnp.dot(patches, w2_ref[...], preferred_element_type=jnp.float32)
    y2 = jnp.maximum(y2 + b2_ref[...], 0.0).astype(jnp.bfloat16)        # (144, 64) bf16

    # 2x2 max-pool on the full map: 4 one-hot bf16 selector matmuls + elementwise max.
    pooled = None
    for k in range(4):
        cand = jnp.dot(sel_ref[k], y2, preferred_element_type=jnp.float32)  # (36, 64) f32
        pooled = cand if pooled is None else jnp.maximum(pooled, cand)

    o_ref[0] = pooled.astype(o_ref.dtype)


def conv_stack(xg, w1big, b1, w2, b2, sel):
    B, R, K = xg.shape            # (B, 144, 81)
    N1 = w1big.shape[1]           # 288
    C2 = w2.shape[1]              # 64
    P = sel.shape[1]              # 36
    return pl.pallas_call(
        _conv_kernel,
        out_shape=jax.ShapeDtypeStruct((B, P, C2), jnp.bfloat16),
        grid=(B,),
        in_specs=[
            pl.BlockSpec((1, R, K), lambda b: (b, 0, 0)),
            pl.BlockSpec((K, N1), lambda b: (0, 0)),      # weights resident across grid
            pl.BlockSpec((1, N1), lambda b: (0, 0)),
            pl.BlockSpec((N1, C2), lambda b: (0, 0)),
            pl.BlockSpec((1, C2), lambda b: (0, 0)),
            pl.BlockSpec((4, P, R), lambda b: (0, 0, 0)),
        ],
        out_specs=pl.BlockSpec((1, P, C2), lambda b: (b, 0, 0)),
        compiler_params=pltpu.CompilerParams(
            dimension_semantics=("parallel",),            # v7x: both TensorCores (B=2)
            vmem_limit_bytes=32 * 1024 * 1024),
    )(xg, w1big, b1, w2, b2, sel)


# --------------- Kernel B: fc1 + ReLU + fc2 + softmax (single step) ---------------

def _fc_kernel(x_ref, w1_ref, b1_ref, w2_ref, b2_ref, o_ref):
    h = jnp.dot(x_ref[...], w1_ref[...], preferred_element_type=jnp.float32)
    h = jnp.maximum(h + b1_ref[...], 0.0).astype(jnp.bfloat16)          # relu(fc1), bf16
    # TODO(synk): nn.Dropout(p=0.5) is identity at inference; no RNG mask here.
    logits = jnp.dot(h, w2_ref[...], preferred_element_type=jnp.float32) + b2_ref[...]
    m = jnp.max(logits, axis=-1, keepdims=True)
    e = jnp.exp(logits - m)
    o_ref[...] = (e / jnp.sum(e, axis=-1, keepdims=True)).astype(o_ref.dtype)  # exact softmax


def fc_stack(flat, w1, b1, w2, b2):
    B, K = flat.shape
    N1 = w1.shape[1]
    N2 = w2.shape[1]
    return pl.pallas_call(
        _fc_kernel,
        out_shape=jax.ShapeDtypeStruct((B, N2), jnp.float32),
        grid=(1,),                                        # whole problem in one step
        in_specs=[
            pl.BlockSpec((B, K), lambda i: (0, 0)),
            pl.BlockSpec((K, N1), lambda i: (0, 0)),
            pl.BlockSpec((1, N1), lambda i: (0, 0)),
            pl.BlockSpec((N1, N2), lambda i: (0, 0)),
            pl.BlockSpec((1, N2), lambda i: (0, 0)),
        ],
        out_specs=pl.BlockSpec((B, N2), lambda i: (0, 0)),
        compiler_params=pltpu.CompilerParams(
            dimension_semantics=("arbitrary",),
            vmem_limit_bytes=32 * 1024 * 1024),
    )(flat, w1, b1, w2, b2)


# ------------------------------- parameters ---------------------------------

def init_params(key, in_h, in_w):
    """Generate PyTorch-layout weights, then fold them once into kernel layouts."""
    ks = jax.random.split(key, 8)
    hc, wc = in_h - 4, in_w - 4          # conv2 output spatial (12, 12)
    hp, wp = hc // 2, wc // 2            # pooled spatial (6, 6)
    fc1_in = 64 * hp * wp                # 2304

    torch_p = {
        "conv1_w": 0.05 * jax.random.normal(ks[0], (32, 1, 3, 3), jnp.float32),
        "conv1_b": 0.05 * jax.random.normal(ks[1], (32,), jnp.float32),
        "conv2_w": 0.05 * jax.random.normal(ks[2], (64, 32, 3, 3), jnp.float32),
        "conv2_b": 0.05 * jax.random.normal(ks[3], (64,), jnp.float32),
        "fc1_w": 0.05 * jax.random.normal(ks[4], (128, fc1_in), jnp.float32),
        "fc1_b": 0.05 * jax.random.normal(ks[5], (128,), jnp.float32),
        "fc2_w": 0.05 * jax.random.normal(ks[6], (2, 128), jnp.float32),
        "fc2_b": 0.05 * jax.random.normal(ks[7], (2,), jnp.float32),
    }

    # conv1 weights (Cout,1,kh,kw) -> (9, 32), then block-diagonal (81, 288) so one
    # matmul on the 81-wide patch tensor evaluates conv1 at all 9 conv2 tap positions.
    w1k = jnp.transpose(torch_p["conv1_w"], (2, 3, 1, 0)).reshape(9, 32)
    w1big = jnp.zeros((81, 288), jnp.float32)
    for t in range(9):
        w1big = w1big.at[t * 9:(t + 1) * 9, t * 32:(t + 1) * 32].set(w1k)
    w1big = w1big.astype(jnp.bfloat16)
    b1t = jnp.tile(torch_p["conv1_b"], 9).reshape(1, 288)

    # conv2 weights (Cout,Cin,kh,kw) -> (9*32, 64) matching the patch column order.
    w2k = jnp.transpose(torch_p["conv2_w"], (2, 3, 1, 0)).reshape(288, 64).astype(jnp.bfloat16)
    b2k = torch_p["conv2_b"].reshape(1, 64)

    # One-hot 2x2 max-pool selectors over the flattened (h*12+w) conv2 rows.
    p = jnp.arange(hp * wp)
    base = (2 * (p // wp)) * wc + 2 * (p % wp)
    rows = base[None, :] + jnp.array([0, 1, wc, wc + 1])[:, None]        # (4, 36)
    sel = (rows[:, :, None] == jnp.arange(hc * wc)[None, None, :]).astype(jnp.bfloat16)

    # fc1: fold the kernel's (ph, pw, co) flatten order into the row permutation of
    # the PyTorch (co, ph, pw)-ordered fc1 weight -> no runtime transpose anywhere.
    perm = jnp.transpose(jnp.arange(fc1_in).reshape(64, hp, wp), (1, 2, 0)).reshape(-1)
    fc1_wk = torch_p["fc1_w"].T[perm].astype(jnp.bfloat16)               # (2304, 128)
    fc1_bk = torch_p["fc1_b"].reshape(1, 128)
    fc2_wk = torch_p["fc2_w"].T.astype(jnp.bfloat16)                     # (128, 2)
    fc2_bk = torch_p["fc2_b"].reshape(1, 2)

    kernel_p = {
        "w1big": w1big, "b1": b1t, "w2": w2k, "b2": b2k, "sel": sel,
        "fc1_w": fc1_wk, "fc1_b": fc1_bk, "fc2_w": fc2_wk, "fc2_b": fc2_bk,
    }
    return kernel_p, torch_p


# ------------------------------- JAX glue -----------------------------------

def forward(params, x_nchw):
    B, _, H, W = x_nchw.shape
    hc, wc = H - 4, W - 4
    x = x_nchw[:, 0].astype(jnp.float32)                 # squeeze Cin=1 -> (B, H, W)

    # Wrapper-side layout plumbing (no arithmetic): 5x5 input patches per conv2
    # output pixel, expanded to the (conv2 tap x conv1 tap) = 81-wide layout the
    # kernel's single conv1 matmul consumes.
    p5 = jnp.stack([x[:, i:i + hc, j:j + wc] for i in range(5) for j in range(5)],
                   axis=-1)                              # (B, 12, 12, 25)
    cols = jnp.array([(dh2 + dh1) * 5 + (dw2 + dw1)
                      for dh2 in range(3) for dw2 in range(3)
                      for dh1 in range(3) for dw1 in range(3)], dtype=jnp.int32)
    xg = p5[..., cols].reshape(B, hc * wc, 81).astype(jnp.bfloat16)

    pooled = conv_stack(xg, params["w1big"], params["b1"],
                        params["w2"], params["b2"], params["sel"])   # (B, 36, 64) bf16

    # TODO(synk): F.dropout(0.25) defaults to training=True in the reference; the
    #             deterministic inference path (identity) is implemented here.
    flat = pooled.reshape(B, -1)                         # free XLA reshape -> (B, 2304)

    return fc_stack(flat, params["fc1_w"], params["fc1_b"],
                    params["fc2_w"], params["fc2_b"])    # (B, 2) f32 probabilities


# ------------------------- pure-JAX f32 reference ---------------------------

def reference_forward(tp, x_nchw):
    dn = ("NCHW", "OIHW", "NCHW")
    y = lax.conv_general_dilated(x_nchw, tp["conv1_w"], (1, 1), "VALID",
                                 dimension_numbers=dn)
    y = jnp.maximum(y + tp["conv1_b"][None, :, None, None], 0.0)
    y = lax.conv_general_dilated(y, tp["conv2_w"], (1, 1), "VALID",
                                 dimension_numbers=dn)
    y = jnp.maximum(y + tp["conv2_b"][None, :, None, None], 0.0)
    y = lax.reduce_window(y, -jnp.inf, lax.max, (1, 1, 2, 2), (1, 1, 2, 2), "VALID")
    y = y.reshape(y.shape[0], -1)
    y = jnp.maximum(y @ tp["fc1_w"].T + tp["fc1_b"], 0.0)
    y = y @ tp["fc2_w"].T + tp["fc2_b"]
    m = jnp.max(y, axis=1, keepdims=True)
    e = jnp.exp(y - m)
    return e / jnp.sum(e, axis=1, keepdims=True)


if __name__ == "__main__":
    key = jax.random.PRNGKey(0)
    kx, kp = jax.random.split(key)

    # small input consistent with the module: batch=2, 1 channel, 16x16 spatial
    x = jax.random.normal(kx, (2, 1, 16, 16), jnp.float32)
    params, torch_params = init_params(kp, 16, 16)

    out = jax.jit(forward)(params, x)
    out = jax.block_until_ready(out)

    assert out.shape == (2, 2)
    assert bool(jnp.all(jnp.isfinite(out)))
    assert jnp.allclose(jnp.sum(out, axis=1), 1.0, atol=1e-3)    # exact softmax divide

    ref = reference_forward(torch_params, x)                     # f32 reference
    assert jnp.allclose(out, ref, atol=3e-2)                     # bf16 MXU tolerance

    print("KERNEL_OK")
</pallas_src>

<mosaic_0001>
module attributes {stable_mosaic.version = 11 : i64} {
  func.func @_conv_kernel(%arg0: i32, %arg1: memref<1x144x81xbf16, #tpu.memory_space<vmem>>, %arg2: memref<81x288xbf16, #tpu.memory_space<vmem>>, %arg3: memref<1x288xf32, #tpu.memory_space<vmem>>, %arg4: memref<288x64xbf16, #tpu.memory_space<vmem>>, %arg5: memref<1x64xf32, #tpu.memory_space<vmem>>, %arg6: memref<4x36x144xbf16, #tpu.memory_space<vmem>>, %arg7: memref<1x36x64xbf16, #tpu.memory_space<vmem>>) attributes {dimension_semantics = [#tpu.dimension_semantics<parallel>], iteration_bounds = array<i64: 2>, scalar_prefetch = 0 : i64, scratch_operands = 0 : i64, tpu.core_type = #tpu.core_type<tc>, window_params = [{transform_indices = @transform_0, window_bounds = array<i64: 1, 144, 81>}, {pipeline_mode = #tpu.pipeline_mode<synchronous>, transform_indices = @transform_1, window_bounds = array<i64: 81, 288>}, {pipeline_mode = #tpu.pipeline_mode<synchronous>, transform_indices = @transform_2, window_bounds = array<i64: 1, 288>}, {pipeline_mode = #tpu.pipeline_mode<synchronous>, transform_indices = @transform_3, window_bounds = array<i64: 288, 64>}, {pipeline_mode = #tpu.pipeline_mode<synchronous>, transform_indices = @transform_4, window_bounds = array<i64: 1, 64>}, {pipeline_mode = #tpu.pipeline_mode<synchronous>, transform_indices = @transform_5, window_bounds = array<i64: 4, 36, 144>}, {transform_indices = @transform_6, window_bounds = array<i64: 1, 36, 64>}]} {
    %c0 = arith.constant 0 : index
    %c0_0 = arith.constant 0 : index
    %c0_1 = arith.constant 0 : index
    %0 = vector.load %arg1[%c0, %c0_0, %c0_1] : memref<1x144x81xbf16, #tpu.memory_space<vmem>>, vector<1x144x81xbf16>
    %1 = vector.shape_cast %0 : vector<1x144x81xbf16> to vector<144x81xbf16>
    %c0_2 = arith.constant 0 : index
    %c0_3 = arith.constant 0 : index
    %2 = vector.load %arg2[%c0_2, %c0_3] : memref<81x288xbf16, #tpu.memory_space<vmem>>, vector<81x288xbf16>
    %cst = arith.constant dense<0.000000e+00> : vector<144x288xf32>
    %3 = tpu.matmul %1, %2, %cst {dimension_numbers = #tpu.dot_dimension_numbers<[1], [0], [0], [1], [0, 0, 1, 1], [], []>} : vector<144x81xbf16>, vector<81x288xbf16>, vector<144x288xf32> -> vector<144x288xf32>
    %c0_4 = arith.constant 0 : index
    %c0_5 = arith.constant 0 : index
    %4 = vector.load %arg3[%c0_4, %c0_5] : memref<1x288xf32, #tpu.memory_space<vmem>>, vector<1x288xf32>
    %5 = vector.broadcast %4 : vector<1x288xf32> to vector<144x288xf32>
    %6 = arith.addf %3, %5 : vector<144x288xf32>
    %cst_6 = arith.constant 0.000000e+00 : f32
    %7 = vector.broadcast %cst_6 : f32 to vector<144x288xf32>
    %8 = arith.maximumf %6, %7 : vector<144x288xf32>
    %9 = arith.truncf %8 : vector<144x288xf32> to vector<144x288xbf16>
    %c0_7 = arith.constant 0 : index
    %c0_8 = arith.constant 0 : index
    %10 = vector.load %arg4[%c0_7, %c0_8] : memref<288x64xbf16, #tpu.memory_space<vmem>>, vector<288x64xbf16>
    %cst_9 = arith.constant dense<0.000000e+00> : vector<144x64xf32>
    %11 = tpu.matmul %9, %10, %cst_9 {dimension_numbers = #tpu.dot_dimension_numbers<[1], [0], [0], [1], [0, 0, 1, 1], [], []>} : vector<144x288xbf16>, vector<288x64xbf16>, vector<144x64xf32> -> vector<144x64xf32>
    %c0_10 = arith.constant 0 : index
    %c0_11 = arith.constant 0 : index
    %12 = vector.load %arg5[%c0_10, %c0_11] : memref<1x64xf32, #tpu.memory_space<vmem>>, vector<1x64xf32>
    %13 = vector.broadcast %12 : vector<1x64xf32> to vector<144x64xf32>
    %14 = arith.addf %11, %13 : vector<144x64xf32>
    %cst_12 = arith.constant 0.000000e+00 : f32
    %15 = vector.broadcast %cst_12 : f32 to vector<144x64xf32>
    %16 = arith.maximumf %14, %15 : vector<144x64xf32>
    %17 = arith.truncf %16 : vector<144x64xf32> to vector<144x64xbf16>
    %c0_13 = arith.constant 0 : index
    %c0_14 = arith.constant 0 : index
    %c0_15 = arith.constant 0 : index
    %18 = vector.load %arg6[%c0_13, %c0_14, %c0_15] : memref<4x36x144xbf16, #tpu.memory_space<vmem>>, vector<1x36x144xbf16>
    %19 = vector.shape_cast %18 : vector<1x36x144xbf16> to vector<36x144xbf16>
    %cst_16 = arith.constant dense<0.000000e+00> : vector<36x64xf32>
    %20 = tpu.matmul %19, %17, %cst_16 {dimension_numbers = #tpu.dot_dimension_numbers<[1], [0], [0], [1], [0, 0, 1, 1], [], []>} : vector<36x144xbf16>, vector<144x64xbf16>, vector<36x64xf32> -> vector<36x64xf32>
    %c1 = arith.constant 1 : index
    %c0_17 = arith.constant 0 : index
    %c0_18 = arith.constant 0 : index
    %21 = vector.load %arg6[%c1, %c0_17, %c0_18] : memref<4x36x144xbf16, #tpu.memory_space<vmem>>, vector<1x36x144xbf16>
    %22 = vector.shape_cast %21 : vector<1x36x144xbf16> to vector<36x144xbf16>
    %cst_19 = arith.constant dense<0.000000e+00> : vector<36x64xf32>
    %23 = tpu.matmul %22, %17, %cst_19 {dimension_numbers = #tpu.dot_dimension_numbers<[1], [0], [0], [1], [0, 0, 1, 1], [], []>} : vector<36x144xbf16>, vector<144x64xbf16>, vector<36x64xf32> -> vector<36x64xf32>
    %24 = arith.maximumf %20, %23 : vector<36x64xf32>
    %c2 = arith.constant 2 : index
    %c0_20 = arith.constant 0 : index
    %c0_21 = arith.constant 0 : index
    %25 = vector.load %arg6[%c2, %c0_20, %c0_21] : memref<4x36x144xbf16, #tpu.memory_space<vmem>>, vector<1x36x144xbf16>
    %26 = vector.shape_cast %25 : vector<1x36x144xbf16> to vector<36x144xbf16>
    %cst_22 = arith.constant dense<0.000000e+00> : vector<36x64xf32>
    %27 = tpu.matmul %26, %17, %cst_22 {dimension_numbers = #tpu.dot_dimension_numbers<[1], [0], [0], [1], [0, 0, 1, 1], [], []>} : vector<36x144xbf16>, vector<144x64xbf16>, vector<36x64xf32> -> vector<36x64xf32>
    %28 = arith.maximumf %24, %27 : vector<36x64xf32>
    %c3 = arith.constant 3 : index
    %c0_23 = arith.constant 0 : index
    %c0_24 = arith.constant 0 : index
    %29 = vector.load %arg6[%c3, %c0_23, %c0_24] : memref<4x36x144xbf16, #tpu.memory_space<vmem>>, vector<1x36x144xbf16>
    %30 = vector.shape_cast %29 : vector<1x36x144xbf16> to vector<36x144xbf16>
    %cst_25 = arith.constant dense<0.000000e+00> : vector<36x64xf32>
    %31 = tpu.matmul %30, %17, %cst_25 {dimension_numbers = #tpu.dot_dimension_numbers<[1], [0], [0], [1], [0, 0, 1, 1], [], []>} : vector<36x144xbf16>, vector<144x64xbf16>, vector<36x64xf32> -> vector<36x64xf32>
    %32 = arith.maximumf %28, %31 : vector<36x64xf32>
    %33 = arith.truncf %32 : vector<36x64xf32> to vector<36x64xbf16>
    %c0_26 = arith.constant 0 : index
    %c0_27 = arith.constant 0 : index
    %c0_28 = arith.constant 0 : index
    %34 = vector.load %arg7[%c0_26, %c0_27, %c0_28] : memref<1x36x64xbf16, #tpu.memory_space<vmem>>, vector<1x36x64xbf16>
    %35 = vector.shape_cast %34 : vector<1x36x64xbf16> to vector<36x64xbf16>
    %36 = vector.shape_cast %33 : vector<36x64xbf16> to vector<1x36x64xbf16>
    tpu.vector_store %arg7[%c0_26, %c0_27, %c0_28], %36 {strides = array<i32>} : memref<1x36x64xbf16, #tpu.memory_space<vmem>>, vector<1x36x64xbf16>,
    return
  }
  func.func @transform_0(%arg0: i32) -> (i32, i32, i32) {
    %c0_i32 = arith.constant 0 : i32
    %c0_i32_0 = arith.constant 0 : i32
    %c0_i32_1 = arith.constant 0 : i32
    return %arg0, %c0_i32, %c0_i32_0 : i32, i32, i32
  }
  func.func @transform_1(%arg0: i32) -> (i32, i32) {
    %c0_i32 = arith.constant 0 : i32
    %c0_i32_0 = arith.constant 0 : i32
    %c0_i32_1 = arith.constant 0 : i32
    return %c0_i32, %c0_i32_0 : i32, i32
  }
  func.func @transform_2(%arg0: i32) -> (i32, i32) {
    %c0_i32 = arith.constant 0 : i32
    %c0_i32_0 = arith.constant 0 : i32
    %c0_i32_1 = arith.constant 0 : i32
    return %c0_i32, %c0_i32_0 : i32, i32
  }
  func.func @transform_3(%arg0: i32) -> (i32, i32) {
    %c0_i32 = arith.constant 0 : i32
    %c0_i32_0 = arith.constant 0 : i32
    %c0_i32_1 = arith.constant 0 : i32
    return %c0_i32, %c0_i32_0 : i32, i32
  }
  func.func @transform_4(%arg0: i32) -> (i32, i32) {
    %c0_i32 = arith.constant 0 : i32
    %c0_i32_0 = arith.constant 0 : i32
    %c0_i32_1 = arith.constant 0 : i32
    return %c0_i32, %c0_i32_0 : i32, i32
  }
  func.func @transform_5(%arg0: i32) -> (i32, i32, i32) {
    %c0_i32 = arith.constant 0 : i32
    %c0_i32_0 = arith.constant 0 : i32
    %c0_i32_1 = arith.constant 0 : i32
    %c0_i32_2 = arith.constant 0 : i32
    return %c0_i32, %c0_i32_0, %c0_i32_1 : i32, i32, i32
  }
  func.func @transform_6(%arg0: i32) -> (i32, i32, i32) {
    %c0_i32 = arith.constant 0 : i32
    %c0_i32_0 = arith.constant 0 : i32
    %c0_i32_1 = arith.constant 0 : i32
    return %arg0, %c0_i32, %c0_i32_0 : i32, i32, i32
  }
}

module attributes {stable_mosaic.version = 11 : i64} {
  func.func @_fc_kernel(%arg0: i32, %arg1: memref<2x2304xbf16, #tpu.memory_space<vmem>>, %arg2: memref<2304x128xbf16, #tpu.memory_space<vmem>>, %arg3: memref<1x128xf32, #tpu.memory_space<vmem>>, %arg4: memref<128x2xbf16, #tpu.memory_space<vmem>>, %arg5: memref<1x2xf32, #tpu.memory_space<vmem>>, %arg6: memref<2x2xf32, #tpu.memory_space<vmem>>) attributes {dimension_semantics = [#tpu.dimension_semantics<arbitrary>], iteration_bounds = array<i64: 1>, scalar_prefetch = 0 : i64, scratch_operands = 0 : i64, tpu.core_type = #tpu.core_type<tc>, window_params = [{pipeline_mode = #tpu.pipeline_mode<synchronous>, transform_indices = @transform_0, window_bounds = array<i64: 2, 2304>}, {pipeline_mode = #tpu.pipeline_mode<synchronous>, transform_indices = @transform_1, window_bounds = array<i64: 2304, 128>}, {pipeline_mode = #tpu.pipeline_mode<synchronous>, transform_indices = @transform_2, window_bounds = array<i64: 1, 128>}, {pipeline_mode = #tpu.pipeline_mode<synchronous>, transform_indices = @transform_3, window_bounds = array<i64: 128, 2>}, {pipeline_mode = #tpu.pipeline_mode<synchronous>, transform_indices = @transform_4, window_bounds = array<i64: 1, 2>}, {pipeline_mode = #tpu.pipeline_mode<synchronous>, transform_indices = @transform_5, window_bounds = array<i64: 2, 2>}]} {
    %c0 = arith.constant 0 : index
    %c0_0 = arith.constant 0 : index
    %0 = vector.load %arg1[%c0, %c0_0] : memref<2x2304xbf16, #tpu.memory_space<vmem>>, vector<2x2304xbf16>
    %c0_1 = arith.constant 0 : index
    %c0_2 = arith.constant 0 : index
    %1 = vector.load %arg2[%c0_1, %c0_2] : memref<2304x128xbf16, #tpu.memory_space<vmem>>, vector<2304x128xbf16>
    %cst = arith.constant dense<0.000000e+00> : vector<2x128xf32>
    %2 = tpu.matmul %0, %1, %cst {dimension_numbers = #tpu.dot_dimension_numbers<[1], [0], [0], [1], [0, 0, 1, 1], [], []>} : vector<2x2304xbf16>, vector<2304x128xbf16>, vector<2x128xf32> -> vector<2x128xf32>
    %c0_3 = arith.constant 0 : index
    %c0_4 = arith.constant 0 : index
    %3 = vector.load %arg3[%c0_3, %c0_4] : memref<1x128xf32, #tpu.memory_space<vmem>>, vector<1x128xf32>
    %4 = vector.broadcast %3 : vector<1x128xf32> to vector<2x128xf32>
    %5 = arith.addf %2, %4 : vector<2x128xf32>
    %cst_5 = arith.constant 0.000000e+00 : f32
    %6 = vector.broadcast %cst_5 : f32 to vector<2x128xf32>
    %7 = arith.maximumf %5, %6 : vector<2x128xf32>
    %8 = arith.truncf %7 : vector<2x128xf32> to vector<2x128xbf16>
    %c0_6 = arith.constant 0 : index
    %c0_7 = arith.constant 0 : index
    %9 = vector.load %arg4[%c0_6, %c0_7] : memref<128x2xbf16, #tpu.memory_space<vmem>>, vector<128x2xbf16>
    %cst_8 = arith.constant dense<0.000000e+00> : vector<2x2xf32>
    %10 = tpu.matmul %8, %9, %cst_8 {dimension_numbers = #tpu.dot_dimension_numbers<[1], [0], [0], [1], [0, 0, 1, 1], [], []>} : vector<2x128xbf16>, vector<128x2xbf16>, vector<2x2xf32> -> vector<2x2xf32>
    %c0_9 = arith.constant 0 : index
    %c0_10 = arith.constant 0 : index
    %11 = vector.load %arg5[%c0_9, %c0_10] : memref<1x2xf32, #tpu.memory_space<vmem>>, vector<1x2xf32>
    %12 = vector.broadcast %11 : vector<1x2xf32> to vector<2x2xf32>
    %13 = arith.addf %10, %12 : vector<2x2xf32>
    %cst_11 = arith.constant dense<0xFF800000> : vector<2xf32>
    %14 = vector.multi_reduction <maximumf>, %13, %cst_11 [1] : vector<2x2xf32> to vector<2xf32>
    %15 = vector.shape_cast %14 : vector<2xf32> to vector<2x1xf32>
    %16 = vector.broadcast %15 : vector<2x1xf32> to vector<2x2xf32>
    %17 = arith.subf %13, %16 : vector<2x2xf32>
    %18 = math.exp %17 : vector<2x2xf32>
    %cst_12 = arith.constant dense<0.000000e+00> : vector<2xf32>
    %19 = vector.multi_reduction <add>, %18, %cst_12 [1] : vector<2x2xf32> to vector<2xf32>
    %20 = vector.shape_cast %19 : vector<2xf32> to vector<2x1xf32>
    %21 = vector.broadcast %20 : vector<2x1xf32> to vector<2x2xf32>
    %22 = arith.divf %18, %21 : vector<2x2xf32>
    %c0_13 = arith.constant 0 : index
    %c0_14 = arith.constant 0 : index
    %23 = vector.load %arg6[%c0_13, %c0_14] : memref<2x2xf32, #tpu.memory_space<vmem>>, vector<2x2xf32>
    tpu.vector_store %arg6[%c0_13, %c0_14], %22 {strides = array<i32>} : memref<2x2xf32, #tpu.memory_space<vmem>>, vector<2x2xf32>,
    return
  }
  func.func @transform_0(%arg0: i32) -> (i32, i32) {
    %c0_i32 = arith.constant 0 : i32
    %c0_i32_0 = arith.constant 0 : i32
    %c0_i32_1 = arith.constant 0 : i32
    return %c0_i32, %c0_i32_0 : i32, i32
  }
  func.func @transform_1(%arg0: i32) -> (i32, i32) {
    %c0_i32 = arith.constant 0 : i32
    %c0_i32_0 = arith.constant 0 : i32
    %c0_i32_1 = arith.constant 0 : i32
    return %c0_i32, %c0_i32_0 : i32, i32
  }
  func.func @transform_2(%arg0: i32) -> (i32, i32) {
    %c0_i32 = arith.constant 0 : i32
    %c0_i32_0 = arith.constant 0 : i32
    %c0_i32_1 = arith.constant 0 : i32
    return %c0_i32, %c0_i32_0 : i32, i32
  }
  func.func @transform_3(%arg0: i32) -> (i32, i32) {
    %c0_i32 = arith.constant 0 : i32
    %c0_i32_0 = arith.constant 0 : i32
    %c0_i32_1 = arith.constant 0 : i32
    return %c0_i32, %c0_i32_0 : i32, i32
  }
  func.func @transform_4(%arg0: i32) -> (i32, i32) {
    %c0_i32 = arith.constant 0 : i32
    %c0_i32_0 = arith.constant 0 : i32
    %c0_i32_1 = arith.constant 0 : i32
    return %c0_i32, %c0_i32_0 : i32, i32
  }
  func.func @transform_5(%arg0: i32) -> (i32, i32) {
    %c0_i32 = arith.constant 0 : i32
    %c0_i32_0 = arith.constant 0 : i32
    %c0_i32_1 = arith.constant 0 : i32
    return %c0_i32, %c0_i32_0 : i32, i32
  }
}

</mosaic_0001>

<bundles_post_ra>
// kernel: forward.2
= control target key start
LH: loop header
LB: loop body
LE: loop exit
PB: predicated region body
PF: predicated region fallthrough
CT: control target
= control target key end

     0   :  { %s1932_s21 = smov 0   ;;  %s2439_s0 = inlined_call_operand.vmem [shape: bf16[2,144,81], index: 0, kind: input, shape index: {}]   ;;  %s2440_s1 = inlined_call_operand.vmem [shape: bf16[81,288], index: 1, kind: input, shape index: {}]   ;;  %s2441_s2 = inlined_call_operand.vmem [shape: f32[1,288], index: 2, kind: input, shape index: {}]   ;;  %s2442_s3 = inlined_call_operand.vmem [shape: bf16[288,64], index: 3, kind: input, shape index: {}]   ;;  %s2443_s4 = inlined_call_operand.vmem [shape: f32[1,64], index: 4, kind: input, shape index: {}]   ;;  %s2444_s5 = inlined_call_operand.vmem [shape: bf16[4,36,144], index: 5, kind: input, shape index: {}]   ;;  %s2445_s6 = inlined_call_operand.vmem [shape: bf16[2,36,64], index: 6, kind: output, shape index: {}]  }
   0x1 LB: > { %s1504_s22 = sadd.s32 4294967295, %s1894_s21   ;;  %p1508_p0 = scmp.ge.s32.totalorder %s1894_s21, 1  ;;  %s1894_s21 = sphi %s1932_s21, %s16_s21  }
   0x2   : > { %p212_p1 = scmp.lt.s32.totalorder %s1894_s21, 3 }
   0x4   : > { %p213_p2 = pnand %p1508_p0, %p212_p1 }
   0x5   : > { %p242_p3 = scmp.lt.s32.totalorder (!%p213_p2), %s1504_s22, 1 }
   0x6   : > { %216 = sbr.rel (%p213_p2) target bundleno = 774 (0x306), region = 44 }
   0xb   : > { %v291_v0 = vld [vmem:[%s2440_s1 + $0x78] sm:$0x11]  ;;  %vm462_vm0 = vcmask 1040384   ;;  %v292_v1 = vld [vmem:[%s2440_s1 + $0x80] sm:$0x1]  ;;  %v1896_v5 = vmov 0  }
   0xc   : > { %v398_v2 = vunpack.c.l.b16 %v291_v0  ;;  %v399_v3 = vunpack.c.h.b16 %v291_v0  ;;  %v400_v4 = vunpack.c.l.b16 %v292_v1  ;;  %v464_v6 = vsel %vm462_vm0, 65535, %v1896_v5  ;;  %v1597_v10 = vld [vmem:[%s2440_s1 + $0x60] sm:$0xf]  ;;  %v1830_v11 = vld [vmem:[%s2440_s1 + $0x68] sm:$0xf0]  ;;  %s2447_s22 = smov (!%p242_p3, %s1504_s22), 1 }
   0xd   : > { %v1829_v12 = vld [vmem:[%s2440_s1 + $0x64] sm:$0xf]  ;;  %v1599_v13 = vld [vmem:[%s2440_s1 + $0x6c] sm:$0xf0]  ;;  %v1605_v17 = vld [vmem:[%s2440_s1 + $0x68] sm:$0xf]  ;;  %v1598_v19 = vor.u32 %v1830_v11, %v1597_v10 }
   0xe   : > { %v416_v7 = vpack.c.b16 %v398_v2, %v398_v2  ;;  %v417_v8 = vpack.c.b16 %v399_v3, %v399_v3  ;;  %v418_v9 = vpack.c.b16 %v400_v4, %v400_v4  ;;  %v1831_v18 = vld [vmem:[%s2440_s1 + $0x70] sm:$0xf0]  ;;  %v1602_v20 = vor.u32 %v1829_v12, %v1599_v13  ;;  %v1585_v21 = vld [vmem:[%s2440_s1 + $0x48] sm:$0xf]  ;;  %v1826_v24 = vld [vmem:[%s2440_s1 + $0x4c] sm:$0xf] }
   0xf   : > { %v1606_v22 = vor.u32 %v1831_v18, %v1605_v17  ;;  %v1827_v23 = vld [vmem:[%s2440_s1 + $0x50] sm:$0xf0]  ;;  %v1587_v25 = vld [vmem:[%s2440_s1 + $0x54] sm:$0xf0]  ;;  %v1593_v26 = vld [vmem:[%s2440_s1 + $0x50] sm:$0xf] }
  0x10   : > { %v466_v14 = vand.u32 %v464_v6, %v416_v7  ;;  %v469_v15 = vand.u32 %v464_v6, %v417_v8  ;;  %v472_v16 = vand.u32 %v464_v6, %v418_v9  ;;  %v1828_v27 = vld [vmem:[%s2440_s1 + $0x58] sm:$0xf0]  ;;  %v1586_v28 = vor.u32 %v1827_v23, %v1585_v21  ;;  %v1573_v30 = vld [vmem:[%s2440_s1 + $0x30] sm:$0xf]  ;;  %v1823_v33 = vld [vmem:[%s2440_s1 + $0x34] sm:$0xf] }
  0x11   : > { %v1590_v29 = vor.u32 %v1826_v24, %v1587_v25  ;;  %v1594_v31 = vor.u32 %v1828_v27, %v1593_v26  ;;  %v1824_v32 = vld [vmem:[%s2440_s1 + $0x38] sm:$0xf0]  ;;  %v1575_v34 = vld [vmem:[%s2440_s1 + $0x3c] sm:$0xf0]  ;;  %v1581_v35 = vld [vmem:[%s2440_s1 + $0x38] sm:$0xf] }
  0x12   : > { %476 = vmatpush.bf16.msra.mxu0 %v466_v14  ;;  %530 = vmatpush.bf16.msra.mxu1 %v469_v15  ;;  %v1825_v36 = vld [vmem:[%s2440_s1 + $0x40] sm:$0xf0]  ;;  %v1574_v37 = vor.u32 %v1824_v32, %v1573_v30  ;;  %v1578_v38 = vor.u32 %v1823_v33, %v1575_v34  ;;  %v1561_v39 = vld [vmem:[%s2440_s1 + $0x18] sm:$0xf]  ;;  %v1820_v42 = vld [vmem:[%s2440_s1 + $0x1c] sm:$0xf] }
  0x13   : > { %584 = vmatpush.bf16.msra.mxu2 %v472_v16  ;;  %v1582_v40 = vor.u32 %v1825_v36, %v1581_v35  ;;  %v1821_v41 = vld [vmem:[%s2440_s1 + $0x20] sm:$0xf0]  ;;  %v1563_v43 = vld [vmem:[%s2440_s1 + $0x24] sm:$0xf0]  ;;  %v1569_v44 = vld [vmem:[%s2440_s1 + $0x20] sm:$0xf] }
  0x14   : > { %v1822_v45 = vld [vmem:[%s2440_s1 + $0x28] sm:$0xf0]  ;;  %v1562_v46 = vor.u32 %v1821_v41, %v1561_v39  ;;  %v1566_v47 = vor.u32 %v1820_v42, %v1563_v43  ;;  %v1549_v48 = vld [vmem:[%s2440_s1] sm:$0xf]  ;;  %s1876_s9 = smul.u32 72, %s2447_s22  ;;  %vm434_vm1 = vcmask 662528  }
  0x15   : > { %v1570_v49 = vor.u32 %v1822_v45, %v1569_v44  ;;  %v1818_v50 = vld [vmem:[%s2440_s1 + $0x8] sm:$0xf0]  ;;  %v1817_v51 = vld [vmem:[%s2440_s1 + $0x4] sm:$0xf]  ;;  %v1551_v52 = vld [vmem:[%s2440_s1 + $0xc] sm:$0xf0] }
  0x16   : > { %477 = vmatpush.bf16.msra.mxu0 %v1598_v19  ;;  %531 = vmatpush.bf16.msra.mxu1 %v1602_v20  ;;  %v1557_v53 = vld [vmem:[%s2440_s1 + $0x8] sm:$0xf]  ;;  %v1819_v54 = vld [vmem:[%s2440_s1 + $0x10] sm:$0xf0]  ;;  %v1550_v55 = vor.u32 %v1818_v50, %v1549_v48  ;;  %v1554_v56 = vor.u32 %v1817_v51, %v1551_v52  ;;  %s2046_s24 = scalar_lea.vmem %s2439_s0, %s1876_s9  ;;  %v1839_v63 = vld [vmem:[%s2442_s3 + $0x38] sm:$0xff]  ;;  %vm865_vm2 = vcmask 261120  }
  0x17   : > { %585 = vmatpush.bf16.msra.mxu2 %v1606_v22  ;;  %v1558_v57 = vor.u32 %v1819_v54, %v1557_v53  ;;  %v1808_v58 = vld [vmem:[%s2046_s24] sm:$0xff]  ;;  %v1809_v59 = vld [vmem:[%s2046_s24 + $0x8] sm:$0xff]  ;;  %v1810_v60 = vld [vmem:[%s2046_s24 + $0x10] sm:$0xff]  ;;  %893 = vmatpush.bf16.msra.mxu3 %v1839_v63  ;;  %vm1111_vm3 = vcmask 130048   ;;  %s1877_s28 = smul.u32 20, %s2447_s22  ;;  %vm1442_vm4 = vcmask 519168  }
  0x18   : > { %v1811_v61 = vld [vmem:[%s2046_s24 + $0x18] sm:$0xff]  ;;  %v1812_v62 = vld [vmem:[%s2046_s24 + $0x20] sm:$0xff]  ;;  %v1813_v0 = vld [vmem:[%s2046_s24 + $0x28] sm:$0xff]  ;;  %vm1447_vm5 = vcmask 517120  }
  0x19   : > { %v1838_v1 = vld [vmem:[%s2442_s3 + $0x30] sm:$0xff]  ;;  %v1847_v2 = vld [vmem:[%s2442_s3 + $0x78] sm:$0xff]  ;;  %v1849_v3 = vld [vmem:[%s2442_s3 + $0x88] sm:$0xff]  ;;  %s2425_s7 = scalar_lea.vmem %s2445_s6, %s1877_s28 }
  0x1a   : > { %478 = vmatpush.bf16.msra.mxu0 %v1586_v28  ;;  %532 = vmatpush.bf16.msra.mxu1 %v1590_v29  ;;  %v1837_v4 = vld [vmem:[%s2442_s3 + $0x28] sm:$0xff]  ;;  %v1846_v5 = vld [vmem:[%s2442_s3 + $0x70] sm:$0xff]  ;;  %v1836_v6 = vld [vmem:[%s2442_s3 + $0x20] sm:$0xff] }
  0x1b   : > { %586 = vmatpush.bf16.msra.mxu2 %v1594_v31  ;;  %894 = vmatpush.bf16.msra.mxu3 %v1838_v1  ;;  %v1845_v7 = vld [vmem:[%s2442_s3 + $0x68] sm:$0xff]  ;;  %v1814_v8 = vld [vmem:[%s2046_s24 + $0x30] sm:$0xff]  ;;  %v1835_v9 = vld [vmem:[%s2442_s3 + $0x18] sm:$0xff] }
  0x1c   : > { %v1844_v10 = vld [vmem:[%s2442_s3 + $0x60] sm:$0xff]  ;;  %v1834_v11 = vld [vmem:[%s2442_s3 + $0x10] sm:$0xff]  ;;  %v1843_v12 = vld [vmem:[%s2442_s3 + $0x58] sm:$0xff] }
  0x1d   : > { %v1833_v13 = vld [vmem:[%s2442_s3 + $0x8] sm:$0xff]  ;;  %v1842_v14 = vld [vmem:[%s2442_s3 + $0x50] sm:$0xff]  ;;  %v1832_v15 = vld [vmem:[%s2442_s3] sm:$0xff] }
  0x1e   : > { %479 = vmatpush.bf16.msra.mxu0 %v1574_v37  ;;  %533 = vmatpush.bf16.msra.mxu1 %v1578_v38  ;;  %v1841_v16 = vld [vmem:[%s2442_s3 + $0x48] sm:$0xff]  ;;  %v1815_v17 = vld [vmem:[%s2046_s24 + $0x38] sm:$0xff]  ;;  %v1840_v18 = vld [vmem:[%s2442_s3 + $0x40] sm:$0xff] }
  0x1f   : > { %587 = vmatpush.bf16.msra.mxu2 %v1582_v40  ;;  %895 = vmatpush.bf16.msra.mxu3 %v1837_v4  ;;  %v1848_v19 = vld [vmem:[%s2442_s3 + $0x80] sm:$0xff] }
  0x20   : > { %v1816_v20 = vld [vmem:[%s2046_s24 + $0x40] sm:$0xff] }
  0x21   : > { %v293_v21 = vld [vmem:[%s2441_s2] sm:$0x7] }
  0x22   : > { %480 = vmatpush.bf16.msra.mxu0 %v1562_v46  ;;  %534 = vmatpush.bf16.msra.mxu1 %v1566_v47  ;;  %v2138_v24 = vperm.slane %v293_v21, 0  ;;  %v2144_v26 = vperm.slane %v293_v21, 1  ;;  %v2148_v32 = vperm.slane %v293_v21, 2 }
  0x23   : > { %588 = vmatpush.bf16.msra.mxu2 %v1570_v49  ;;  %896 = vmatpush.bf16.msra.mxu3 %v1836_v6 }
  0x26   : > { %481 = vmatpush.bf16.msra.mxu0 %v1550_v55  ;;  %535 = vmatpush.bf16.msra.mxu1 %v1554_v56 }
  0x27   : > { %589 = vmatpush.bf16.msra.mxu2 %v1558_v57  ;;  %897 = vmatpush.bf16.msra.mxu3 %v1835_v9 }
  0x29   : > { %1607 = vmatmul.msk.bf16.vlgmr.msra.gmra.mxu0 %vm434_vm1, %v1808_v58  ;;  %1616 = vmatmul.msk.bf16.vlgmr.msra.gmra.mxu1 %vm434_vm1, %v1808_v58 }
  0x2a   : > { %1625 = vmatmul.msk.bf16.vlgmr.msra.gmra.mxu2 %vm434_vm1, %v1808_v58  ;;  %947 = vmatpush.bf16.msrb.mxu0 %v1847_v2 }
  0x2b   : > { %1007 = vmatpush.bf16.msrb.mxu1 %v1849_v3  ;;  %898 = vmatpush.bf16.msra.mxu3 %v1834_v11 }
  0x2e   : > { %948 = vmatpush.bf16.msrb.mxu0 %v1846_v5 }
  0x2f   : > { %899 = vmatpush.bf16.msra.mxu3 %v1833_v13  ;;  %1008 = vmatpush.bf16.msrb.mxu1 %v1848_v19 }
  0x32   : > { %949 = vmatpush.bf16.msrb.mxu0 %v1845_v7 }
  0x33   : > { %900 = vmatpush.bf16.msra.mxu3 %v1832_v15 }
  0x36   : > { %950 = vmatpush.bf16.msrb.mxu0 %v1844_v10 }
  0x37   : > { %1866 = vmatpush.bf16.msrb.mxu3 %v1849_v3 }
  0x39   : > { %1608 = vmatmul.msk.bf16.gmra.mxu0 %vm434_vm1, %v1809_v59  ;;  %1617 = vmatmul.msk.bf16.gmra.mxu1 %vm434_vm1, %v1809_v59 }
  0x3a   : > { %1626 = vmatmul.msk.bf16.gmra.mxu2 %vm434_vm1, %v1809_v59  ;;  %951 = vmatpush.bf16.msrb.mxu0 %v1843_v12 }
  0x3b   : > { %1867 = vmatpush.bf16.msrb.mxu3 %v1848_v19 }
  0x3e   : > { %952 = vmatpush.bf16.msrb.mxu0 %v1842_v14 }
  0x42   : > { %953 = vmatpush.bf16.msrb.mxu0 %v1841_v16 }
  0x46   : > { %954 = vmatpush.bf16.msrb.mxu0 %v1840_v18 }
  0x49   : > { %1609 = vmatmul.msk.bf16.gmra.mxu0 %vm434_vm1, %v1810_v60  ;;  %1618 = vmatmul.msk.bf16.gmra.mxu1 %vm434_vm1, %v1810_v60 }
  0x4a   : > { %1627 = vmatmul.msk.bf16.gmra.mxu2 %vm434_vm1, %v1810_v60 }
  0x59   : > { %1610 = vmatmul.msk.bf16.gmra.mxu0 %vm434_vm1, %v1811_v61  ;;  %1619 = vmatmul.msk.bf16.gmra.mxu1 %vm434_vm1, %v1811_v61 }
  0x5a   : > { %1628 = vmatmul.msk.bf16.gmra.mxu2 %vm434_vm1, %v1811_v61 }
  0x69   : > { %1611 = vmatmul.msk.bf16.gmra.mxu0 %vm434_vm1, %v1812_v62  ;;  %1620 = vmatmul.msk.bf16.gmra.mxu1 %vm434_vm1, %v1812_v62 }
  0x6a   : > { %1629 = vmatmul.msk.bf16.gmra.mxu2 %vm434_vm1, %v1812_v62 }
  0x79   : > { %1612 = vmatmul.msk.bf16.gmra.mxu0 %vm434_vm1, %v1813_v0  ;;  %1621 = vmatmul.msk.bf16.gmra.mxu1 %vm434_vm1, %v1813_v0 }
  0x7a   : > { %1630 = vmatmul.msk.bf16.gmra.mxu2 %vm434_vm1, %v1813_v0 }
  0x89   : > { %1613 = vmatmul.msk.bf16.gmra.mxu0 %vm434_vm1, %v1814_v8  ;;  %1622 = vmatmul.msk.bf16.gmra.mxu1 %vm434_vm1, %v1814_v8 }
  0x8a   : > { %1631 = vmatmul.msk.bf16.gmra.mxu2 %vm434_vm1, %v1814_v8 }
  0x99   : > { %1614 = vmatmul.msk.bf16.gmra.mxu0 %vm434_vm1, %v1815_v17  ;;  %1623 = vmatmul.msk.bf16.gmra.mxu1 %vm434_vm1, %v1815_v17 }
  0x9a   : > { %1632 = vmatmul.msk.bf16.gmra.mxu2 %vm434_vm1, %v1815_v17 }
  0xa6   : > { %v483_v22 = vpop.f32.mrf.mxu0  ;;  %v537_v23 = vpop.f32.mrf.mxu1 }
  0xa7   : > { %v484_v25 = vadd.f32 %v483_v22, %v2138_v24  ;;  %v538_v34 = vadd.f32 %v537_v23, %v2144_v26 }
  0xa9   : > { %1615 = vmatmul.msk.bf16.gmra.mxu0 %vm434_vm1, %v1816_v20  ;;  %1624 = vmatmul.msk.bf16.gmra.mxu1 %vm434_vm1, %v1816_v20  ;;  %v636_v33 = vmax.f32 %v484_v25, 0.0  ;;  %v637_v39 = vmax.f32 %v538_v34, 0.0 }
  0xaa   : > { %1633 = vmatmul.msk.bf16.gmra.mxu2 %vm434_vm1, %v1816_v20 }
  0xad   : > { %v591_v27 = vpop.f32.mrf.mxu2 }
  0xae   : > { %v485_v28 = vpop.f32.mrf.mxu0  ;;  %v539_v29 = vpop.f32.mrf.mxu1  ;;  %v592_v38 = vadd.f32 %v591_v27, %v2148_v32 }
  0xaf   : > { %v486_v30 = vadd.f32 %v485_v28, %v2138_v24  ;;  %v540_v31 = vadd.f32 %v539_v29, %v2144_v26 }
  0xb0   : > { %v638_v45 = vmax.f32 %v592_v38, 0.0 }
  0xb1   : > { %v639_v35 = vmax.f32 %v486_v30, 0.0  ;;  %v640_v36 = vmax.f32 %v540_v31, 0.0 }
  0xb3   : > { %v690_v37 = vpack.c.bf16 %v639_v35, %v636_v33  ;;  %v691_v44 = vpack.c.bf16 %v640_v36, %v637_v39 }
  0xb5   : > { %v593_v40 = vpop.f32.mrf.mxu2  ;;  %901 = vmatmul.bf16.vlgmr.msra.gmra.mxu3 %v690_v37 }
  0xb6   : > { %v594_v41 = vadd.f32 %v593_v40, %v2148_v32  ;;  %v488_v42 = vpop.f32.mrf.mxu0  ;;  %v542_v43 = vpop.f32.mrf.mxu1 }
  0xb7   : > { %v489_v48 = vadd.f32 %v488_v42, %v2138_v24  ;;  %v543_v55 = vadd.f32 %v542_v43, %v2144_v26 }
  0xb8   : > { %v641_v46 = vmax.f32 %v594_v41, 0.0 }
  0xb9   : > { %955 = vmatmul.bf16.vlgmr.msrb.gmra.mxu0 %v691_v44  ;;  %v642_v54 = vmax.f32 %v489_v48, 0.0  ;;  %v643_v60 = vmax.f32 %v543_v55, 0.0 }
  0xba   : > { %v692_v47 = vpack.c.bf16 %v641_v46, %v638_v45 }
  0xbc   : > { %1706 = vmatmul.msk.bf16.vlgmr.msrb.gmra.mxu1 %vm865_vm2, %v692_v47 }
  0xbd   : > { %v596_v49 = vpop.f32.mrf.mxu2 }
  0xbe   : > { %v490_v50 = vpop.f32.mrf.mxu0  ;;  %v544_v51 = vpop.f32.mrf.mxu1  ;;  %v597_v59 = vadd.f32 %v596_v49, %v2148_v32 }
  0xbf   : > { %v491_v52 = vadd.f32 %v490_v50, %v2138_v24  ;;  %v545_v53 = vadd.f32 %v544_v51, %v2144_v26 }
  0xc0   : > { %v644_v2 = vmax.f32 %v597_v59, 0.0 }
  0xc1   : > { %v645_v56 = vmax.f32 %v491_v52, 0.0  ;;  %v646_v57 = vmax.f32 %v545_v53, 0.0 }
  0xc3   : > { %v693_v58 = vpack.c.bf16 %v645_v56, %v642_v54  ;;  %v694_v1 = vpack.c.bf16 %v646_v57, %v643_v60 }
  0xc5   : > { %v598_v61 = vpop.f32.mrf.mxu2  ;;  %906 = vmatmul.bf16.gmra.mxu3 %v693_v58 }
  0xc6   : > { %v599_v62 = vadd.f32 %v598_v61, %v2148_v32  ;;  %v493_v63 = vpop.f32.mrf.mxu0  ;;  %v547_v0 = vpop.f32.mrf.mxu1 }
  0xc7   : > { %v494_v5 = vadd.f32 %v493_v63, %v2138_v24  ;;  %v548_v12 = vadd.f32 %v547_v0, %v2144_v26 }
  0xc8   : > { %v647_v3 = vmax.f32 %v599_v62, 0.0 }
  0xc9   : > { %960 = vmatmul.bf16.gmra.mxu0 %v694_v1  ;;  %v648_v11 = vmax.f32 %v494_v5, 0.0  ;;  %v649_v17 = vmax.f32 %v548_v12, 0.0 }
  0xca   : > { %v695_v4 = vpack.c.bf16 %v647_v3, %v644_v2 }
  0xcc   : > { %1707 = vmatmul.msk.bf16.gmra.mxu1 %vm865_vm2, %v695_v4 }
  0xcd   : > { %v601_v6 = vpop.f32.mrf.mxu2 }
  0xce   : > { %v495_v7 = vpop.f32.mrf.mxu0  ;;  %v549_v8 = vpop.f32.mrf.mxu1  ;;  %v602_v16 = vadd.f32 %v601_v6, %v2148_v32 }
  0xcf   : > { %v496_v9 = vadd.f32 %v495_v7, %v2138_v24  ;;  %v550_v10 = vadd.f32 %v549_v8, %v2144_v26 }
  0xd0   : > { %v650_v23 = vmax.f32 %v602_v16, 0.0 }
  0xd1   : > { %v651_v13 = vmax.f32 %v496_v9, 0.0  ;;  %v652_v14 = vmax.f32 %v550_v10, 0.0 }
  0xd3   : > { %v696_v15 = vpack.c.bf16 %v651_v13, %v648_v11  ;;  %v697_v22 = vpack.c.bf16 %v652_v14, %v649_v17 }
  0xd5   : > { %v603_v18 = vpop.f32.mrf.mxu2  ;;  %911 = vmatmul.bf16.gmra.mxu3 %v696_v15 }
  0xd6   : > { %v604_v19 = vadd.f32 %v603_v18, %v2148_v32  ;;  %v498_v20 = vpop.f32.mrf.mxu0  ;;  %v552_v21 = vpop.f32.mrf.mxu1 }
  0xd7   : > { %v499_v28 = vadd.f32 %v498_v20, %v2138_v24  ;;  %v553_v36 = vadd.f32 %v552_v21, %v2144_v26 }
  0xd8   : > { %v653_v25 = vmax.f32 %v604_v19, 0.0 }
  0xd9   : > { %965 = vmatmul.bf16.gmra.mxu0 %v697_v22  ;;  %v654_v35 = vmax.f32 %v499_v28, 0.0  ;;  %v655_v41 = vmax.f32 %v553_v36, 0.0 }
  0xda   : > { %v698_v27 = vpack.c.bf16 %v653_v25, %v650_v23 }
  0xdc   : > { %1708 = vmatmul.msk.bf16.gmra.mxu1 %vm865_vm2, %v698_v27 }
  0xdd   : > { %v606_v29 = vpop.f32.mrf.mxu2 }
  0xde   : > { %v500_v30 = vpop.f32.mrf.mxu0  ;;  %v554_v31 = vpop.f32.mrf.mxu1  ;;  %v607_v40 = vadd.f32 %v606_v29, %v2148_v32 }
  0xdf   : > { %v501_v33 = vadd.f32 %v500_v30, %v2138_v24  ;;  %v555_v34 = vadd.f32 %v554_v31, %v2144_v26 }
  0xe0   : > { %v656_v47 = vmax.f32 %v607_v40, 0.0 }
  0xe1   : > { %v657_v37 = vmax.f32 %v501_v33, 0.0  ;;  %v658_v38 = vmax.f32 %v555_v34, 0.0 }
  0xe3   : > { %v699_v39 = vpack.c.bf16 %v657_v37, %v654_v35  ;;  %v700_v46 = vpack.c.bf16 %v658_v38, %v655_v41 }
  0xe5   : > { %v608_v42 = vpop.f32.mrf.mxu2  ;;  %916 = vmatmul.bf16.gmra.mxu3 %v699_v39 }
  0xe6   : > { %v609_v43 = vadd.f32 %v608_v42, %v2148_v32  ;;  %v503_v44 = vpop.f32.mrf.mxu0  ;;  %v557_v45 = vpop.f32.mrf.mxu1 }
  0xe7   : > { %v504_v50 = vadd.f32 %v503_v44, %v2138_v24  ;;  %v558_v57 = vadd.f32 %v557_v45, %v2144_v26 }
  0xe8   : > { %v659_v48 = vmax.f32 %v609_v43, 0.0 }
  0xe9   : > { %970 = vmatmul.bf16.gmra.mxu0 %v700_v46  ;;  %v660_v56 = vmax.f32 %v504_v50, 0.0  ;;  %v661_v62 = vmax.f32 %v558_v57, 0.0 }
  0xea   : > { %v701_v49 = vpack.c.bf16 %v659_v48, %v656_v47 }
  0xec   : > { %1709 = vmatmul.msk.bf16.gmra.mxu1 %vm865_vm2, %v701_v49 }
  0xed   : > { %v611_v51 = vpop.f32.mrf.mxu2 }
  0xee   : > { %v505_v52 = vpop.f32.mrf.mxu0  ;;  %v559_v53 = vpop.f32.mrf.mxu1  ;;  %v612_v61 = vadd.f32 %v611_v51, %v2148_v32 }
  0xef   : > { %v506_v54 = vadd.f32 %v505_v52, %v2138_v24  ;;  %v560_v55 = vadd.f32 %v559_v53, %v2144_v26 }
  0xf0   : > { %v662_v4 = vmax.f32 %v612_v61, 0.0 }
  0xf1   : > { %v663_v58 = vmax.f32 %v506_v54, 0.0  ;;  %v664_v59 = vmax.f32 %v560_v55, 0.0 }
  0xf3   : > { %v702_v60 = vpack.c.bf16 %v663_v58, %v660_v56  ;;  %v703_v3 = vpack.c.bf16 %v664_v59, %v661_v62 }
  0xf5   : > { %v613_v63 = vpop.f32.mrf.mxu2  ;;  %921 = vmatmul.bf16.gmra.mxu3 %v702_v60 }
  0xf6   : > { %v614_v0 = vadd.f32 %v613_v63, %v2148_v32  ;;  %v508_v1 = vpop.f32.mrf.mxu0  ;;  %v562_v2 = vpop.f32.mrf.mxu1 }
  0xf7   : > { %v509_v7 = vadd.f32 %v508_v1, %v2138_v24  ;;  %v563_v14 = vadd.f32 %v562_v2, %v2144_v26 }
  0xf8   : > { %v665_v5 = vmax.f32 %v614_v0, 0.0 }
  0xf9   : > { %975 = vmatmul.bf16.gmra.mxu0 %v703_v3  ;;  %v666_v13 = vmax.f32 %v509_v7, 0.0  ;;  %v667_v19 = vmax.f32 %v563_v14, 0.0 }
  0xfa   : > { %v704_v6 = vpack.c.bf16 %v665_v5, %v662_v4 }
  0xfc   : > { %1710 = vmatmul.msk.bf16.gmra.mxu1 %vm865_vm2, %v704_v6 }
  0xfd   : > { %v616_v8 = vpop.f32.mrf.mxu2 }
  0xfe   : > { %v510_v9 = vpop.f32.mrf.mxu0  ;;  %v564_v10 = vpop.f32.mrf.mxu1  ;;  %v617_v18 = vadd.f32 %v616_v8, %v2148_v32 }
  0xff   : > { %v511_v11 = vadd.f32 %v510_v9, %v2138_v24  ;;  %v565_v12 = vadd.f32 %v564_v10, %v2144_v26 }
 0x100   : > { %v668_v27 = vmax.f32 %v617_v18, 0.0 }
 0x101   : > { %v669_v15 = vmax.f32 %v511_v11, 0.0  ;;  %v670_v16 = vmax.f32 %v565_v12, 0.0 }
 0x103   : > { %v705_v17 = vpack.c.bf16 %v669_v15, %v666_v13  ;;  %v706_v25 = vpack.c.bf16 %v670_v16, %v667_v19 }
 0x105   : > { %v618_v20 = vpop.f32.mrf.mxu2  ;;  %926 = vmatmul.bf16.gmra.mxu3 %v705_v17 }
 0x106   : > { %v619_v21 = vadd.f32 %v618_v20, %v2148_v32  ;;  %v513_v22 = vpop.f32.mrf.mxu0  ;;  %v567_v23 = vpop.f32.mrf.mxu1 }
 0x107   : > { %v514_v30 = vadd.f32 %v513_v22, %v2138_v24  ;;  %v568_v38 = vadd.f32 %v567_v23, %v2144_v26 }
 0x108   : > { %v671_v28 = vmax.f32 %v619_v21, 0.0  ;;  %v2210_v21 = vld [vmem:[%s2443_s4] ss:$0 sm:$0xff] }
 0x109   : > { %980 = vmatmul.bf16.gmra.mxu0 %v706_v25  ;;  %v672_v37 = vmax.f32 %v514_v30, 0.0  ;;  %v673_v43 = vmax.f32 %v568_v38, 0.0 }
 0x10a   : > { %v707_v29 = vpack.c.bf16 %v671_v28, %v668_v27 }
 0x10c   : > { %1711 = vmatmul.msk.bf16.gmra.mxu1 %vm865_vm2, %v707_v29 }
 0x10d   : > { %v621_v31 = vpop.f32.mrf.mxu2 }
 0x10e   : > { %v515_v33 = vpop.f32.mrf.mxu0  ;;  %v569_v34 = vpop.f32.mrf.mxu1  ;;  %v622_v42 = vadd.f32 %v621_v31, %v2148_v32 }
 0x10f   : > { %v516_v35 = vadd.f32 %v515_v33, %v2138_v24  ;;  %v570_v36 = vadd.f32 %v569_v34, %v2144_v26 }
 0x110   : > { %v674_v49 = vmax.f32 %v622_v42, 0.0 }
 0x111   : > { %v675_v39 = vmax.f32 %v516_v35, 0.0  ;;  %v676_v40 = vmax.f32 %v570_v36, 0.0 }
 0x113   : > { %v708_v41 = vpack.c.bf16 %v675_v39, %v672_v37  ;;  %v709_v48 = vpack.c.bf16 %v676_v40, %v673_v43 }
 0x115   : > { %v623_v44 = vpop.f32.mrf.mxu2  ;;  %931 = vmatmul.bf16.gmra.mxu3 %v708_v41 }
 0x116   : > { %v624_v45 = vadd.f32 %v623_v44, %v2148_v32  ;;  %v518_v46 = vpop.f32.mrf.mxu0  ;;  %v572_v47 = vpop.f32.mrf.mxu1 }
 0x117   : > { %v519_v52 = vadd.f32 %v518_v46, %v2138_v24  ;;  %v573_v59 = vadd.f32 %v572_v47, %v2144_v26 }
 0x118   : > { %v677_v50 = vmax.f32 %v624_v45, 0.0 }
 0x119   : > { %985 = vmatmul.bf16.gmra.mxu0 %v709_v48  ;;  %v678_v58 = vmax.f32 %v519_v52, 0.0  ;;  %v679_v0 = vmax.f32 %v573_v59, 0.0 }
 0x11a   : > { %v710_v51 = vpack.c.bf16 %v677_v50, %v674_v49 }
 0x11c   : > { %1712 = vmatmul.msk.bf16.gmra.mxu1 %vm865_vm2, %v710_v51 }
 0x11d   : > { %v626_v53 = vpop.f32.mrf.mxu2 }
 0x11e   : > { %v520_v54 = vpop.f32.mrf.mxu0  ;;  %v574_v55 = vpop.f32.mrf.mxu1  ;;  %v627_v63 = vadd.f32 %v626_v53, %v2148_v32 }
 0x11f   : > { %v521_v56 = vadd.f32 %v520_v54, %v2138_v24  ;;  %v575_v57 = vadd.f32 %v574_v55, %v2144_v26 }
 0x120   : > { %v680_v6 = vmax.f32 %v627_v63, 0.0 }
 0x121   : > { %v681_v60 = vmax.f32 %v521_v56, 0.0  ;;  %v682_v61 = vmax.f32 %v575_v57, 0.0 }
 0x123   : > { %v711_v62 = vpack.c.bf16 %v681_v60, %v678_v58  ;;  %v712_v5 = vpack.c.bf16 %v682_v61, %v679_v0 }
 0x125   : > { %v628_v1 = vpop.f32.mrf.mxu2  ;;  %936 = vmatmul.bf16.gmra.mxu3 %v711_v62 }
 0x126   : > { %v629_v2 = vadd.f32 %v628_v1, %v2148_v32  ;;  %v523_v3 = vpop.f32.mrf.mxu0  ;;  %v577_v4 = vpop.f32.mrf.mxu1 }
 0x127   : > { %v524_v9 = vadd.f32 %v523_v3, %v2138_v24  ;;  %v578_v16 = vadd.f32 %v577_v4, %v2144_v26 }
 0x128   : > { %v683_v7 = vmax.f32 %v629_v2, 0.0 }
 0x129   : > { %990 = vmatmul.bf16.gmra.mxu0 %v712_v5  ;;  %v684_v15 = vmax.f32 %v524_v9, 0.0  ;;  %v685_v20 = vmax.f32 %v578_v16, 0.0 }
 0x12a   : > { %v713_v8 = vpack.c.bf16 %v683_v7, %v680_v6 }
 0x12c   : > { %1713 = vmatmul.msk.bf16.gmra.mxu1 %vm865_vm2, %v713_v8 }
 0x12d   : > { %v631_v10 = vpop.f32.mrf.mxu2 }
 0x12e   : > { %v525_v11 = vpop.f32.mrf.mxu0  ;;  %v579_v12 = vpop.f32.mrf.mxu1 }
 0x12f   : > { %v526_v13 = vadd.f32 %v525_v11, %v2138_v24  ;;  %v580_v14 = vadd.f32 %v579_v12, %v2144_v26  ;;  %v632_v24 = vadd.f32 %v631_v10, %v2148_v32 }
 0x131   : > { %v687_v17 = vmax.f32 %v526_v13, 0.0  ;;  %v688_v18 = vmax.f32 %v580_v14, 0.0  ;;  %v686_v31 = vmax.f32 %v632_v24, 0.0 }
 0x133   : > { %v714_v19 = vpack.c.bf16 %v687_v17, %v684_v15  ;;  %v715_v25 = vpack.c.bf16 %v688_v18, %v685_v20 }
 0x135   : > { %941 = vmatmul.bf16.gmra.mxu3 %v714_v19  ;;  %v633_v23 = vpop.f32.mrf.mxu2 }
 0x136   : > { %v956_v22 = vpop.f32.mrf.mxu0  ;;  %v634_v26 = vadd.f32 %v633_v23, %v2148_v32 }
 0x138   : > { %v902_v27 = vpop.f32.mrf.mxu3  ;;  %v689_v34 = vmax.f32 %v634_v26, 0.0 }
 0x139   : > { %v903_v28 = vadd.f32 %v2210_v21, %v902_v27  ;;  %v1010_v29 = vpop.f32.mrf.mxu1  ;;  %995 = vmatmul.bf16.gmra.mxu0 %v715_v25 }
 0x13a   : > { %v716_v37 = vpack.c.bf16 %v689_v34, %v686_v31 }
 0x13b   : > { %v957_v30 = vadd.f32 %v956_v22, %v903_v28 }
 0x13d   : > { %v1011_v33 = vadd.f32 %v1010_v29, %v957_v30 }
 0x13e   : > { %v958_v35 = vpop.f32.mrf.mxu0 }
 0x13f   : > { %v1055_v43 = vmax.f32 %v1011_v33, 0.0 }
 0x140   : > { %v904_v36 = vpop.f32.mrf.mxu3 }
 0x141   : > { %v905_v38 = vadd.f32 %v2210_v21, %v904_v36  ;;  %v1012_v39 = vpop.f32.mrf.mxu1 }
 0x143   : > { %v959_v40 = vadd.f32 %v958_v35, %v905_v38 }
 0x145   : > { %v1013_v41 = vadd.f32 %v1012_v39, %v959_v40  ;;  %1714 = vmatmul.msk.bf16.vlgmr.msrb.gmra.mxu3 %vm865_vm2, %v716_v37 }
 0x146   : > { %v961_v42 = vpop.f32.mrf.mxu0 }
 0x147   : > { %v1056_v44 = vmax.f32 %v1013_v41, 0.0 }
 0x148   : > { %v907_v45 = vpop.f32.mrf.mxu3 }
 0x149   : > { %v2217_v46 = vpack.c.bf16 %v1056_v44, %v1055_v43  ;;  %v908_v32 = vadd.f32 %v2210_v21, %v907_v45  ;;  %v1015_v47 = vpop.f32.mrf.mxu1 }
 0x14b   : > { %v962_v48 = vadd.f32 %v961_v42, %v908_v32 }
 0x14d   : > { %v1016_v49 = vadd.f32 %v1015_v47, %v962_v48 }
 0x14e   : > { %v963_v50 = vpop.f32.mrf.mxu0 }
 0x14f   : > { %v1057_v57 = vmax.f32 %v1016_v49, 0.0 }
 0x150   : > { %v909_v51 = vpop.f32.mrf.mxu3 }
 0x151   : > { %v910_v52 = vadd.f32 %v2210_v21, %v909_v51  ;;  %v1017_v53 = vpop.f32.mrf.mxu1 }
 0x153   : > { %v964_v54 = vadd.f32 %v963_v50, %v910_v52 }
 0x155   : > { %v1018_v55 = vadd.f32 %v1017_v53, %v964_v54 }
 0x156   : > { %v966_v56 = vpop.f32.mrf.mxu0 }
 0x157   : > { %v1058_v58 = vmax.f32 %v1018_v55, 0.0 }
 0x158   : > { %v912_v59 = vpop.f32.mrf.mxu3 }
 0x159   : > { %v2221_v60 = vpack.c.bf16 %v1058_v58, %v1057_v57  ;;  %v913_v61 = vadd.f32 %v2210_v21, %v912_v59  ;;  %v1020_v62 = vpop.f32.mrf.mxu1 }
 0x15b   : > { %v967_v63 = vadd.f32 %v966_v56, %v913_v61 }
 0x15d   : > { %v1021_v0 = vadd.f32 %v1020_v62, %v967_v63 }
 0x15e   : > { %v968_v1 = vpop.f32.mrf.mxu0 }
 0x15f   : > { %v1059_v8 = vmax.f32 %v1021_v0, 0.0 }
 0x160   : > { %v914_v2 = vpop.f32.mrf.mxu3 }
 0x161   : > { %v915_v3 = vadd.f32 %v2210_v21, %v914_v2  ;;  %v1022_v4 = vpop.f32.mrf.mxu1 }
 0x163   : > { %v969_v5 = vadd.f32 %v968_v1, %v915_v3 }
 0x165   : > { %v1023_v6 = vadd.f32 %v1022_v4, %v969_v5 }
 0x166   : > { %v971_v7 = vpop.f32.mrf.mxu0 }
 0x167   : > { %v1060_v9 = vmax.f32 %v1023_v6, 0.0 }
 0x168   : > { %v917_v10 = vpop.f32.mrf.mxu3 }
 0x169   : > { %v2225_v11 = vpack.c.bf16 %v1060_v9, %v1059_v8  ;;  %v918_v12 = vadd.f32 %v2210_v21, %v917_v10  ;;  %v1025_v13 = vpop.f32.mrf.mxu1 }
 0x16b   : > { %v972_v14 = vadd.f32 %v971_v7, %v918_v12 }
 0x16d   : > { %v1026_v15 = vadd.f32 %v1025_v13, %v972_v14 }
 0x16e   : > { %v973_v16 = vpop.f32.mrf.mxu0 }
 0x16f   : > { %v1061_v25 = vmax.f32 %v1026_v15, 0.0 }
 0x170   : > { %v919_v17 = vpop.f32.mrf.mxu3 }
 0x171   : > { %v920_v18 = vadd.f32 %v2210_v21, %v919_v17  ;;  %v1027_v19 = vpop.f32.mrf.mxu1 }
 0x173   : > { %v974_v20 = vadd.f32 %v973_v16, %v920_v18 }
 0x175   : > { %v1028_v22 = vadd.f32 %v1027_v19, %v974_v20 }
 0x176   : > { %v976_v23 = vpop.f32.mrf.mxu0 }
 0x177   : > { %v1062_v27 = vmax.f32 %v1028_v22, 0.0 }
 0x178   : > { %v922_v24 = vpop.f32.mrf.mxu3 }
 0x179   : > { %v2229_v28 = vpack.c.bf16 %v1062_v27, %v1061_v25  ;;  %v923_v29 = vadd.f32 %v2210_v21, %v922_v24  ;;  %v1030_v26 = vpop.f32.mrf.mxu1 }
 0x17b   : > { %v977_v30 = vadd.f32 %v976_v23, %v923_v29 }
 0x17d   : > { %v2232_v31 = vadd.f32 %v1030_v26, %v977_v30 }
 0x17e   : > { %v978_v33 = vpop.f32.mrf.mxu0 }
 0x17f   : > { %v1063_v24 = vmax.f32 %v2232_v31, 0.0 }
 0x180   : > { %v924_v34 = vpop.f32.mrf.mxu3 }
 0x181   : > { %v1032_v35 = vpop.f32.mrf.mxu1  ;;  %v925_v2 = vadd.f32 %v2210_v21, %v924_v34 }
 0x183   : > { %v979_v12 = vadd.f32 %v978_v33, %v925_v2  ;;  %v1856_v2 = vld [vmem:[%s2444_s5 + $0x3c] sm:$0xf] }
 0x185   : > { %v1033_v18 = vadd.f32 %v1032_v35, %v979_v12  ;;  %v1862_v12 = vld [vmem:[%s2444_s5 + $0x7c] sm:$0xf] }
 0x186   : > { %v981_v36 = vpop.f32.mrf.mxu0 }
 0x187   : > { %v1064_v25 = vmax.f32 %v1033_v18, 0.0 }
 0x188   : > { %v927_v37 = vpop.f32.mrf.mxu3 }
 0x189   : > { %v1035_v38 = vpop.f32.mrf.mxu1  ;;  %v928_v61 = vadd.f32 %v2210_v21, %v927_v37  ;;  %v2254_v26 = vpack.c.bf16 %v1064_v25, %v1063_v24  ;;  %v1775_v25 = vld [vmem:[%s2444_s5 + $0x68] sm:$0xf0]  ;;  %v1861_v24 = vld [vmem:[%s2444_s5 + $0x64] sm:$0xf0] }
 0x18b   : > { %v982_v6 = vadd.f32 %v981_v36, %v928_v61  ;;  %v1743_v61 = vld [vmem:[%s2444_s5 + $0x30] sm:$0xf0] }
 0x18d   : > { %v1036_v16 = vadd.f32 %v1035_v38, %v982_v6 }
 0x18e   : > { %v983_v39 = vpop.f32.mrf.mxu0 }
 0x18f   : > { %v1065_v22 = vmax.f32 %v1036_v16, 0.0 }
 0x190   : > { %v929_v40 = vpop.f32.mrf.mxu3 }
 0x191   : > { %v1037_v41 = vpop.f32.mrf.mxu1  ;;  %v930_v56 = vadd.f32 %v2210_v21, %v929_v40  ;;  %v1717_v40 = vld [vmem:[%s2444_s5] sm:$0xf] }
 0x193   : > { %v984_v3 = vadd.f32 %v983_v39, %v930_v56 }
 0x195   : > { %v1038_v13 = vadd.f32 %v1037_v41, %v984_v3  ;;  %v1751_v3 = vld [vmem:[%s2444_s5 + $0x40] sm:$0xf0] }
 0x196   : > { %v986_v42 = vpop.f32.mrf.mxu0  ;;  %v1754_v6 = vor.u32 %v1856_v2, %v1751_v3 }
 0x197   : > { %v1066_v19 = vmax.f32 %v1038_v13, 0.0 }
 0x198   : > { %v932_v43 = vpop.f32.mrf.mxu3 }
 0x199   : > { %v1040_v44 = vpop.f32.mrf.mxu1  ;;  %v933_v53 = vadd.f32 %v2210_v21, %v932_v43  ;;  %v2249_v27 = vpack.c.bf16 %v1066_v19, %v1065_v22  ;;  %v1850_v43 = vld [vmem:[%s2444_s5 + $0x4] sm:$0xf]  ;;  %v1765_v22 = vld [vmem:[%s2444_s5 + $0x50] sm:$0xf] }
 0x19b   : > { %v987_v62 = vadd.f32 %v986_v42, %v933_v53 }
 0x19d   : > { %v1041_v7 = vadd.f32 %v1040_v44, %v987_v62  ;;  %v1719_v44 = vld [vmem:[%s2444_s5 + $0x8] sm:$0xf0]  ;;  %v1741_v62 = vld [vmem:[%s2444_s5 + $0x28] sm:$0xf] }
 0x19e   : > { %v988_v45 = vpop.f32.mrf.mxu0 }
 0x19f   : > { %v1067_v17 = vmax.f32 %v1041_v7, 0.0 }
 0x1a0   : > { %v934_v32 = vpop.f32.mrf.mxu3 }
 0x1a1   : > { %v1042_v47 = vpop.f32.mrf.mxu1  ;;  %v935_v52 = vadd.f32 %v2210_v21, %v934_v32 }
 0x1a3   : > { %v989_v57 = vadd.f32 %v988_v45, %v935_v52 }
 0x1a5   : > { %v1043_v4 = vadd.f32 %v1042_v47, %v989_v57  ;;  %v1722_v47 = vor.u32 %v1850_v43, %v1719_v44  ;;  %v1797_v44 = vld [vmem:[%s2444_s5 + $0x88] sm:$0xf] }
 0x1a6   : > { %v991_v48 = vpop.f32.mrf.mxu0 }
 0x1a7   : > { %v1068_v14 = vmax.f32 %v1043_v4, 0.0  ;;  %v1749_v4 = vld [vmem:[%s2444_s5 + $0x38] sm:$0xf] }
 0x1a8   : > { %v937_v49 = vpop.f32.mrf.mxu3 }
 0x1a9   : > { %v1045_v50 = vpop.f32.mrf.mxu1  ;;  %v938_v51 = vadd.f32 %v2210_v21, %v937_v49  ;;  %v2245_v20 = vpack.c.bf16 %v1068_v14, %v1067_v17  ;;  %v1853_v49 = vld [vmem:[%s2444_s5 + $0x14] sm:$0xf0] }
 0x1ab   : > { %v992_v54 = vadd.f32 %v991_v48, %v938_v51  ;;  %v1725_v48 = vld [vmem:[%s2444_s5 + $0x10] sm:$0xf]  ;;  %v1727_v51 = vld [vmem:[%s2444_s5 + $0x18] sm:$0xf0] }
 0x1ac   : > { %v1726_v52 = vor.u32 %v1853_v49, %v1725_v48 }
 0x1ad   : > { %v1046_v63 = vadd.f32 %v1045_v50, %v992_v54  ;;  %v1852_v50 = vld [vmem:[%s2444_s5 + $0x14] sm:$0xf]  ;;  %v1086_v54 = vld [vmem:[%s2444_s5 + $0x20] sm:$0x33] }
 0x1ae   : > { %v993_v59 = vpop.f32.mrf.mxu0  ;;  %v1730_v53 = vor.u32 %v1852_v50, %v1727_v51  ;;  %v1100_v56 = vunpack.c.l.b16 %v1086_v54 }
 0x1af   : > { %v1069_v8 = vmax.f32 %v1046_v63, 0.0  ;;  %v1855_v63 = vld [vmem:[%s2444_s5 + $0x2c] sm:$0xf0] }
 0x1b0   : > { %v939_v55 = vpop.f32.mrf.mxu3 }
 0x1b1   : > { %v940_v58 = vadd.f32 %v2210_v21, %v939_v55  ;;  %v1047_v1 = vpop.f32.mrf.mxu1  ;;  %v1101_v55 = vunpack.c.h.b16 %v1086_v54 }
 0x1b3   : > { %v994_v0 = vadd.f32 %v993_v59, %v940_v58  ;;  %v1107_v57 = vpack.c.b16 %v1101_v55, %v1101_v55  ;;  %v1106_v58 = vpack.c.b16 %v1100_v56, %v1100_v56  ;;  %v1854_v59 = vld [vmem:[%s2444_s5 + $0x2c] sm:$0xf] }
 0x1b5   : > { %v1048_v5 = vadd.f32 %v1047_v1, %v994_v0  ;;  %v1746_v0 = vor.u32 %v1854_v59, %v1743_v61  ;;  %v1742_v1 = vor.u32 %v1855_v63, %v1741_v62 }
 0x1b6   : > { %v996_v29 = vpop.f32.mrf.mxu0 }
 0x1b7   : > { %v1070_v9 = vmax.f32 %v1048_v5, 0.0  ;;  %v1857_v5 = vld [vmem:[%s2444_s5 + $0x3c] sm:$0xf0] }
 0x1b8   : > { %v942_v10 = vpop.f32.mrf.mxu3  ;;  %v1750_v7 = vor.u32 %v1857_v5, %v1749_v4 }
 0x1b9   : > { %v2241_v15 = vpack.c.bf16 %v1070_v9, %v1069_v8  ;;  %v943_v33 = vadd.f32 %v2210_v21, %v942_v10  ;;  %v1738_v8 = vld [vmem:[%s2444_s5 + $0x48] sm:$0x33]  ;;  %v1789_v9 = vld [vmem:[%s2444_s5 + $0x78] sm:$0xf]  ;;  %v1863_v10 = vld [vmem:[%s2444_s5 + $0x7c] sm:$0xf0] }
 0x1ba   : > { %v1187_v13 = vunpack.c.h.b16 %v1738_v8  ;;  %v1790_v14 = vor.u32 %v1863_v10, %v1789_v9  ;;  %v1186_v16 = vunpack.c.l.b16 %v1738_v8 }
 0x1bb   : > { %1121 = vmatpush.bf16.msrb.mxu2 %v2241_v15  ;;  %1386 = vmatpush.bf16.msra.mxu0 %v2241_v15  ;;  %v997_v31 = vadd.f32 %v996_v29, %v943_v33  ;;  %v1799_v33 = vld [vmem:[%s2444_s5 + $0x90] sm:$0xf0] }
 0x1bc   : > { %v1193_v18 = vpack.c.b16 %v1187_v13, %v1187_v13  ;;  %v1192_v19 = vpack.c.b16 %v1186_v16, %v1186_v16 }
 0x1be   : > { %v998_v35 = vpop.f32.mrf.mxu0 }
 0x1bf   : > { %1122 = vmatpush.bf16.msrb.mxu2 %v2245_v20  ;;  %1387 = vmatpush.bf16.msra.mxu0 %v2245_v20 }
 0x1c0   : > { %v944_v23 = vpop.f32.mrf.mxu3 }
 0x1c1   : > { %v945_v34 = vadd.f32 %v2210_v21, %v944_v23  ;;  %v1851_v21 = vld [vmem:[%s2444_s5 + $0x4] sm:$0xf0] }
 0x1c2   : > { %v1718_v32 = vor.u32 %v1851_v21, %v1717_v40 }
 0x1c3   : > { %1123 = vmatpush.bf16.msrb.mxu2 %v2249_v27  ;;  %1388 = vmatpush.bf16.msra.mxu0 %v2249_v27  ;;  %v999_v37 = vadd.f32 %v998_v35, %v945_v34 }
 0x1c7   : > { %1124 = vmatpush.bf16.msrb.mxu2 %v2254_v26  ;;  %1389 = vmatpush.bf16.msra.mxu0 %v2254_v26 }
 0x1c8   : > { %v1050_v30 = vpop.f32.mrf.mxu3 }
 0x1c9   : > { %v1051_v36 = vadd.f32 %v1050_v30, %v997_v31  ;;  %v1864_v30 = vld [vmem:[%s2444_s5 + $0x8c] sm:$0xf]  ;;  %v1762_v31 = vld [vmem:[%s2444_s5 + $0x70] sm:$0x33] }
 0x1ca   : > { %v1802_v34 = vor.u32 %v1864_v30, %v1799_v33  ;;  %v1277_v35 = vunpack.c.h.b16 %v1762_v31 }
 0x1cb   : > { %1125 = vmatpush.bf16.msrb.mxu2 %v2229_v28  ;;  %1390 = vmatpush.bf16.msra.mxu0 %v2229_v28  ;;  %v1071_v41 = vmax.f32 %v1051_v36, 0.0  ;;  %v1276_v36 = vunpack.c.l.b16 %v1762_v31 }
 0x1cd   : > { %v1282_v40 = vpack.c.b16 %v1276_v36, %v1276_v36 }
 0x1cf   : > { %1126 = vmatpush.bf16.msrb.mxu2 %v2225_v11  ;;  %1391 = vmatpush.bf16.msra.mxu0 %v2225_v11 }
 0x1d0   : > { %v1052_v38 = vpop.f32.mrf.mxu3 }
 0x1d1   : > { %v1053_v39 = vadd.f32 %v1052_v38, %v999_v37  ;;  %v1786_v37 = vld [vmem:[%s2444_s5 + $0x98] sm:$0x33]  ;;  %v1283_v38 = vpack.c.b16 %v1277_v35, %v1277_v35 }
 0x1d3   : > { %v1072_v42 = vmax.f32 %v1053_v39, 0.0  ;;  %1127 = vmatpush.bf16.msrb.mxu2 %v2221_v60  ;;  %1392 = vmatpush.bf16.msra.mxu0 %v2221_v60  ;;  %v1367_v39 = vunpack.c.h.b16 %v1786_v37 }
 0x1d5   : > { %v1081_v45 = vpack.c.bf16 %v1072_v42, %v1071_v41  ;;  %v1373_v21 = vpack.c.b16 %v1367_v39, %v1367_v39 }
 0x1d7   : > { %1128 = vmatpush.bf16.msrb.mxu2 %v2217_v46  ;;  %1151 = vmatpush.bf16.msra.mxu3 %v1081_v45 }
 0x1d8   : > { %1393 = vmatpush.bf16.msra.mxu0 %v2217_v46  ;;  %1416 = vmatpush.bf16.msra.mxu1 %v1081_v45 }
 0x1da   : > { %1129 = vmatmul.bf16.vlgmr.msrb.gmra.mxu2 %v1718_v32  ;;  %1731 = vmatmul.msk.bf16.vlgmr.msra.gmra.mxu3 %vm1111_vm3, %v1722_v47 }
 0x1db   : > { %1206 = vmatpush.bf16.msra.mxu2 %v2241_v15  ;;  %1236 = vmatpush.bf16.msrb.mxu3 %v1081_v45 }
 0x1dc   : > { %1394 = vmatmul.bf16.vlgmr.msra.gmra.mxu0 %v1790_v14 }
 0x1df   : > { %1326 = vmatpush.bf16.msra.mxu3 %v1081_v45  ;;  %1207 = vmatpush.bf16.msra.mxu2 %v2245_v20  ;;  %v1865_v45 = vld [vmem:[%s2444_s5 + $0x8c] sm:$0xf0] }
 0x1e0   : > { %v1798_v49 = vor.u32 %v1865_v45, %v1797_v44 }
 0x1e3   : > { %1208 = vmatpush.bf16.msra.mxu2 %v2249_v27 }
 0x1e7   : > { %1209 = vmatpush.bf16.msra.mxu2 %v2254_v26 }
 0x1ea   : > { %1134 = vmatmul.bf16.gmra.mxu2 %v1726_v52  ;;  %1732 = vmatmul.msk.bf16.gmra.mxu3 %vm1111_vm3, %v1730_v53  ;;  %v1366_v53 = vunpack.c.l.b16 %v1786_v37 }
 0x1eb   : > { %1210 = vmatpush.bf16.msra.mxu2 %v2229_v28 }
 0x1ef   : > { %1211 = vmatpush.bf16.msra.mxu2 %v2225_v11 }
 0x1f3   : > { %1212 = vmatpush.bf16.msra.mxu2 %v2221_v60 }
 0x1f7   : > { %1213 = vmatpush.bf16.msra.mxu2 %v2217_v46 }
 0x1fa   : > { %1733 = vmatmul.msk.bf16.gmra.mxu3 %vm1111_vm3, %v1107_v57  ;;  %1139 = vmatmul.bf16.gmra.mxu2 %v1106_v58  ;;  %v1372_v57 = vpack.c.b16 %v1366_v53, %v1366_v53 }
 0x1fb   : > { %1296 = vmatpush.bf16.msrb.mxu2 %v2241_v15 }
 0x1ff   : > { %1297 = vmatpush.bf16.msrb.mxu2 %v2245_v20 }
 0x203   : > { %1298 = vmatpush.bf16.msrb.mxu2 %v2249_v27 }
 0x207   : > { %1299 = vmatpush.bf16.msrb.mxu2 %v2254_v26 }
 0x20a   : > { %1755 = vmatmul.msk.bf16.vlgmr.msrb.gmra.mxu3 %vm1111_vm3, %v1746_v0  ;;  %1214 = vmatmul.bf16.vlgmr.msra.gmra.mxu2 %v1742_v1 }
 0x20b   : > { %1300 = vmatpush.bf16.msrb.mxu2 %v2229_v28 }
 0x20f   : > { %1301 = vmatpush.bf16.msrb.mxu2 %v2225_v11 }
 0x213   : > { %1302 = vmatpush.bf16.msrb.mxu2 %v2221_v60 }
 0x217   : > { %1303 = vmatpush.bf16.msrb.mxu2 %v2217_v46 }
 0x21a   : > { %1756 = vmatmul.msk.bf16.gmra.mxu3 %vm1111_vm3, %v1754_v6  ;;  %1219 = vmatmul.bf16.gmra.mxu2 %v1750_v7 }
 0x21b   : > { %1868 = vmatpush.bf16.msra.mxu2 %v2241_v15  ;;  %v1791_v15 = vld [vmem:[%s2444_s5 + $0x80] sm:$0xf0] }
 0x21c   : > { %v1794_v17 = vor.u32 %v1862_v12, %v1791_v15 }
 0x21e   : > { %1803 = vmatmul.msk.bf16.vlgmr.msra.gmra.mxu1 %vm1111_vm3, %v1794_v17 }
 0x21f   : > { %1869 = vmatpush.bf16.msra.mxu2 %v2245_v20  ;;  %v1858_v20 = vld [vmem:[%s2444_s5 + $0x54] sm:$0xf] }
 0x223   : > { %1870 = vmatpush.bf16.msra.mxu2 %v2249_v27  ;;  %v1773_v27 = vld [vmem:[%s2444_s5 + $0x60] sm:$0xf] }
 0x227   : > { %1871 = vmatpush.bf16.msra.mxu2 %v2254_v26  ;;  %v1774_v26 = vor.u32 %v1861_v24, %v1773_v27 }
 0x22a   : > { %1757 = vmatmul.msk.bf16.gmra.mxu3 %vm1111_vm3, %v1193_v18  ;;  %1224 = vmatmul.bf16.gmra.mxu2 %v1192_v19 }
 0x22b   : > { %1872 = vmatpush.bf16.msra.mxu2 %v2229_v28  ;;  %v1767_v28 = vld [vmem:[%s2444_s5 + $0x58] sm:$0xf0] }
 0x22c   : > { %v1770_v23 = vor.u32 %v1858_v20, %v1767_v28 }
 0x22e   : > { %1804 = vmatmul.msk.bf16.gmra.mxu1 %vm1111_vm3, %v1802_v34 }
 0x22f   : > { %1873 = vmatpush.bf16.msra.mxu2 %v2225_v11  ;;  %v1859_v11 = vld [vmem:[%s2444_s5 + $0x54] sm:$0xf0] }
 0x233   : > { %1874 = vmatpush.bf16.msra.mxu2 %v2221_v60  ;;  %v1766_v60 = vor.u32 %v1859_v11, %v1765_v22 }
 0x237   : > { %1875 = vmatpush.bf16.msra.mxu2 %v2217_v46  ;;  %v1860_v46 = vld [vmem:[%s2444_s5 + $0x64] sm:$0xf] }
 0x238   : > { %v1778_v29 = vor.u32 %v1860_v46, %v1775_v25 }
 0x23a   : > { %1779 = vmatmul.msk.bf16.vlgmr.msra.gmra.mxu3 %vm1111_vm3, %v1770_v23  ;;  %1304 = vmatmul.bf16.vlgmr.msrb.gmra.mxu2 %v1766_v60 }
 0x23e   : > { %1805 = vmatmul.msk.bf16.gmra.mxu1 %vm1111_vm3, %v1373_v21 }
 0x24a   : > { %1780 = vmatmul.msk.bf16.gmra.mxu3 %vm1111_vm3, %v1778_v29  ;;  %1309 = vmatmul.bf16.gmra.mxu2 %v1774_v26 }
 0x259   : > { %v1395_v20 = vpop.f32.mrf.mxu0 }
 0x25a   : > { %1781 = vmatmul.msk.bf16.gmra.mxu3 %vm1111_vm3, %v1283_v38  ;;  %1314 = vmatmul.bf16.gmra.mxu2 %v1282_v40 }
 0x25d   : > { %v1130_v41 = vpop.f32.mrf.mxu2  ;;  %v1153_v42 = vpop.f32.mrf.mxu3 }
 0x25e   : > { %v1154_v43 = vadd.f32 %v1153_v42, %v1130_v41 }
 0x261   : > { %v1397_v26 = vpop.f32.mrf.mxu0 }
 0x265   : > { %v1132_v32 = vpop.f32.mrf.mxu2  ;;  %v1155_v47 = vpop.f32.mrf.mxu3 }
 0x266   : > { %v1156_v48 = vadd.f32 %v1155_v47, %v1132_v32 }
 0x26a   : > { %1399 = vmatmul.bf16.vlgmr.msra.gmra.mxu2 %v1798_v49 }
 0x26d   : > { %v1135_v50 = vpop.f32.mrf.mxu2  ;;  %v1158_v51 = vpop.f32.mrf.mxu3 }
 0x26e   : > { %v2412_v52 = vadd.f32 %v1158_v51, %v1135_v50 }
 0x275   : > { %v1137_v54 = vpop.f32.mrf.mxu2  ;;  %v1160_v55 = vpop.f32.mrf.mxu3 }
 0x276   : > { %v2414_v56 = vadd.f32 %v1160_v55, %v1137_v54 }
 0x27a   : > { %1404 = vmatmul.bf16.gmra.mxu2 %v1372_v57 }
 0x27d   : > { %v1163_v58 = vpop.f32.mrf.mxu3  ;;  %v1140_v59 = vpop.f32.mrf.mxu2 }
 0x27e   : > { %v2416_v61 = vadd.f32 %v1163_v58, %v1140_v59 }
 0x285   : > { %v1165_v62 = vpop.f32.mrf.mxu3  ;;  %v1142_v63 = vpop.f32.mrf.mxu2 }
 0x28d   : > { %v1238_v0 = vpop.f32.mrf.mxu3  ;;  %v1215_v1 = vpop.f32.mrf.mxu2 }
 0x28e   : > { %v1239_v28 = vadd.f32 %v1238_v0, %v1215_v1 }
 0x290   : > { %v1252_v23 = vmax.f32 %v1154_v43, %v1239_v28 }
 0x295   : > { %v1240_v2 = vpop.f32.mrf.mxu3  ;;  %v1217_v3 = vpop.f32.mrf.mxu2 }
 0x296   : > { %v1241_v24 = vadd.f32 %v1240_v2, %v1217_v3 }
 0x298   : > { %v1253_v31 = vmax.f32 %v1156_v48, %v1241_v24 }
 0x29b   : > { %v1418_v18 = vpop.f32.mrf.mxu1 }
 0x29c   : > { %v1419_v46 = vadd.f32 %v1418_v18, %v1395_v20 }
 0x29d   : > { %v1243_v4 = vpop.f32.mrf.mxu3  ;;  %v1220_v5 = vpop.f32.mrf.mxu2 }
 0x29e   : > { %v1244_v6 = vadd.f32 %v1243_v4, %v1220_v5 }
 0x2a0   : > { %v1254_v7 = vmax.f32 %v2412_v52, %v1244_v6 }
 0x2a3   : > { %v1420_v25 = vpop.f32.mrf.mxu1 }
 0x2a4   : > { %v1421_v36 = vadd.f32 %v1420_v25, %v1397_v26 }
 0x2a5   : > { %v1245_v8 = vpop.f32.mrf.mxu3  ;;  %v1222_v9 = vpop.f32.mrf.mxu2 }
 0x2a6   : > { %v1246_v10 = vadd.f32 %v1245_v8, %v1222_v9 }
 0x2a8   : > { %v1255_v12 = vmax.f32 %v2414_v56, %v1246_v10 }
 0x2ab   : > { %v1423_v37 = vpop.f32.mrf.mxu1 }
 0x2ad   : > { %v1248_v13 = vpop.f32.mrf.mxu3  ;;  %v1225_v14 = vpop.f32.mrf.mxu2 }
 0x2ae   : > { %v1249_v15 = vadd.f32 %v1248_v13, %v1225_v14 }
 0x2b0   : > { %v1256_v16 = vmax.f32 %v2416_v61, %v1249_v15 }
 0x2b3   : > { %v1425_v42 = vpop.f32.mrf.mxu1 }
 0x2b5   : > { %v1250_v17 = vpop.f32.mrf.mxu3  ;;  %v1227_v19 = vpop.f32.mrf.mxu2 }
 0x2bb   : > { %v1428_v45 = vpop.f32.mrf.mxu1 }
 0x2bd   : > { %v1328_v22 = vpop.f32.mrf.mxu3  ;;  %v1305_v11 = vpop.f32.mrf.mxu2 }
 0x2be   : > { %v1329_v60 = vadd.f32 %v1328_v22, %v1305_v11 }
 0x2c0   : > { %v1342_v27 = vmax.f32 %v1252_v23, %v1329_v60 }
 0x2c2   : > { %v1432_v29 = vmax.f32 %v1342_v27, %v1419_v46 }
 0x2c3   : > { %v1430_v48 = vpop.f32.mrf.mxu1 }
 0x2c4   : > { %v1437_v30 = vpack.c.bf16 %v1432_v29, %v1432_v29 }
 0x2c5   : > { %v1330_v33 = vpop.f32.mrf.mxu3  ;;  %v1307_v34 = vpop.f32.mrf.mxu2 }
 0x2c6   : > { %1443 = vst.msk [vmem:[%s2425_s7] sm:$0xf] %vm1442_vm4, %v1437_v30  ;;  %v1331_v35 = vadd.f32 %v1330_v33, %v1307_v34 }
 0x2c8   : > { %v1343_v38 = vmax.f32 %v1253_v31, %v1331_v35 }
 0x2ca   : > { %v1433_v39 = vmax.f32 %v1343_v38, %v1421_v36 }
 0x2cc   : > { %v1438_v40 = vpack.c.bf16 %v1433_v39, %v1433_v39 }
 0x2cd   : > { %v1333_v21 = vpop.f32.mrf.mxu3  ;;  %v1310_v41 = vpop.f32.mrf.mxu2 }
 0x2ce   : > { %1444 = vst.msk [vmem:[%s2425_s7 + $0x4] sm:$0xf] %vm1442_vm4, %v1438_v40  ;;  %v1334_v51 = vadd.f32 %v1333_v21, %v1310_v41 }
 0x2d0   : > { %v1344_v53 = vmax.f32 %v1254_v7, %v1334_v51 }
 0x2d5   : > { %v1335_v43 = vpop.f32.mrf.mxu3  ;;  %v1312_v44 = vpop.f32.mrf.mxu2 }
 0x2d6   : > { %v1336_v56 = vadd.f32 %v1335_v43, %v1312_v44 }
 0x2d8   : > { %v1345_v59 = vmax.f32 %v1255_v12, %v1336_v56 }
 0x2dd   : > { %v1338_v32 = vpop.f32.mrf.mxu3  ;;  %v1315_v47 = vpop.f32.mrf.mxu2 }
 0x2de   : > { %v1339_v63 = vadd.f32 %v1338_v32, %v1315_v47 }
 0x2e0   : > { %v1346_v2 = vmax.f32 %v1256_v16, %v1339_v63 }
 0x2e5   : > { %v1340_v49 = vpop.f32.mrf.mxu3  ;;  %v1317_v50 = vpop.f32.mrf.mxu2 }
 0x2ed   : > { %v1400_v52 = vpop.f32.mrf.mxu2 }
 0x2ee   : > { %v1424_v54 = vadd.f32 %v1423_v37, %v1400_v52 }
 0x2f0   : > { %v1434_v55 = vmax.f32 %v1344_v53, %v1424_v54 }
 0x2f2   : > { %v1439_v57 = vpack.c.bf16 %v1434_v55, %v1434_v55 }
 0x2f4   : > { %1445 = vst.msk [vmem:[%s2425_s7 + $0x8] sm:$0xf] %vm1442_vm4, %v1439_v57 }
 0x2f5   : > { %v1402_v58 = vpop.f32.mrf.mxu2 }
 0x2f6   : > { %v1426_v61 = vadd.f32 %v1425_v42, %v1402_v58 }
 0x2f8   : > { %v1435_v62 = vmax.f32 %v1345_v59, %v1426_v61 }
 0x2fa   : > { %v1440_v0 = vpack.c.bf16 %v1435_v62, %v1435_v62 }
 0x2fc   : > { %1446 = vst.msk [vmem:[%s2425_s7 + $0xc] sm:$0xf] %vm1442_vm4, %v1440_v0 }
 0x2fd   : > { %v1405_v1 = vpop.f32.mrf.mxu2 }
 0x2fe   : > { %v1429_v3 = vadd.f32 %v1428_v45, %v1405_v1 }
 0x300   : > { %v1436_v4 = vmax.f32 %v1346_v2, %v1429_v3 }
 0x302   : > { %v1441_v5 = vpack.c.bf16 %v1436_v4, %v1436_v4 }
 0x304   : > { %1448 = vst.msk [vmem:[%s2425_s7 + $0x10] sm:$0x3] %vm1447_vm5, %v1441_v5 }
 0x305   : > { %v1407_v6 = vpop.f32.mrf.mxu2 }
 0x306 PF: > { %s16_s21 = sadd.s32 1, %s1894_s21  }
 0x307   : > { %p13_p4 = scmp.ge.s32.totalorder %s16_s21, 4  }
 0x309   :  { %15 = sbr.rel (!%p13_p4) target bundleno = 1 (0x1), region = 77 }

// kernel: forward.3
= control target key start
LH: loop header
LB: loop body
LE: loop exit
PB: predicated region body
PF: predicated region fallthrough
CT: control target
= control target key end

     0   :  { %s2885_s0 = inlined_call_operand.vmem [shape: bf16[2,2304], index: 0, kind: input, shape index: {}]   ;;  %s2886_s1 = inlined_call_operand.vmem [shape: bf16[2304,128], index: 1, kind: input, shape index: {}]   ;;  %s2887_s2 = inlined_call_operand.vmem [shape: f32[1,128], index: 2, kind: input, shape index: {}]   ;;  %s2888_s3 = inlined_call_operand.vmem [shape: bf16[128,2], index: 3, kind: input, shape index: {}]   ;;  %s2889_s4 = inlined_call_operand.vmem [shape: f32[1,2], index: 4, kind: input, shape index: {}]   ;;  %s2890_s5 = inlined_call_operand.hbm [shape: f32[2,2], index: 5, kind: output, shape index: {}]  }
   0x1   :  { %v2196_v0 = vld [vmem:[%s2886_s1 + $0x38] sm:$0xff]  ;;  %v2195_v4 = vld [vmem:[%s2886_s1 + $0x30] sm:$0xff]  ;;  %v2194_v8 = vld [vmem:[%s2886_s1 + $0x28] sm:$0xff] }
   0x2   :  { %v2204_v1 = vld [vmem:[%s2886_s1 + $0x78] sm:$0xff]  ;;  %1222 = vmatpush.bf16.msra.mxu0 %v2196_v0  ;;  %v2203_v5 = vld [vmem:[%s2886_s1 + $0x70] sm:$0xff]  ;;  %v2202_v9 = vld [vmem:[%s2886_s1 + $0x68] sm:$0xff] }
   0x3   :  { %v2212_v2 = vld [vmem:[%s2886_s1 + $0xb8] sm:$0xff]  ;;  %1235 = vmatpush.bf16.msra.mxu1 %v2204_v1  ;;  %v2211_v6 = vld [vmem:[%s2886_s1 + $0xb0] sm:$0xff]  ;;  %v2210_v10 = vld [vmem:[%s2886_s1 + $0xa8] sm:$0xff] }
   0x4   :  { %v2220_v3 = vld [vmem:[%s2886_s1 + $0xf8] sm:$0xff]  ;;  %1248 = vmatpush.bf16.msra.mxu2 %v2212_v2  ;;  %v2219_v7 = vld [vmem:[%s2886_s1 + $0xf0] sm:$0xff]  ;;  %v2218_v11 = vld [vmem:[%s2886_s1 + $0xe8] sm:$0xff] }
   0x5   :  { %1261 = vmatpush.bf16.msra.mxu3 %v2220_v3  ;;  %v2193_v12 = vld [vmem:[%s2886_s1 + $0x20] sm:$0xff]  ;;  %v2192_v16 = vld [vmem:[%s2886_s1 + $0x18] sm:$0xff]  ;;  %v2191_v21 = vld [vmem:[%s2886_s1 + $0x10] sm:$0xff] }
   0x6   :  { %1223 = vmatpush.bf16.msra.mxu0 %v2195_v4  ;;  %v2201_v13 = vld [vmem:[%s2886_s1 + $0x60] sm:$0xff]  ;;  %v2200_v17 = vld [vmem:[%s2886_s1 + $0x58] sm:$0xff]  ;;  %v2199_v22 = vld [vmem:[%s2886_s1 + $0x50] sm:$0xff] }
   0x7   :  { %1236 = vmatpush.bf16.msra.mxu1 %v2203_v5  ;;  %v2209_v14 = vld [vmem:[%s2886_s1 + $0xa0] sm:$0xff]  ;;  %v2208_v18 = vld [vmem:[%s2886_s1 + $0x98] sm:$0xff]  ;;  %v2207_v23 = vld [vmem:[%s2886_s1 + $0x90] sm:$0xff] }
   0x8   :  { %1249 = vmatpush.bf16.msra.mxu2 %v2211_v6  ;;  %v2217_v15 = vld [vmem:[%s2886_s1 + $0xe0] sm:$0xff]  ;;  %v2216_v19 = vld [vmem:[%s2886_s1 + $0xd8] sm:$0xff]  ;;  %v2215_v24 = vld [vmem:[%s2886_s1 + $0xd0] sm:$0xff] }
   0x9   :  { %1262 = vmatpush.bf16.msra.mxu3 %v2219_v7  ;;  %v21_v20 = vld [vmem:[%s2885_s0] sm:$0xff] }
   0xa   :  { %1224 = vmatpush.bf16.msra.mxu0 %v2194_v8  ;;  %317 = vst [vmem:[#allocation1] ss:$9 sm:$0xff] %v21_v20 }
   0xb   :  { %1237 = vmatpush.bf16.msra.mxu1 %v2202_v9 }
   0xc   :  { %1250 = vmatpush.bf16.msra.mxu2 %v2210_v10 }
   0xd   :  { %1263 = vmatpush.bf16.msra.mxu3 %v2218_v11 }
   0xe   :  { %1225 = vmatpush.bf16.msra.mxu0 %v2193_v12 }
   0xf   :  { %1238 = vmatpush.bf16.msra.mxu1 %v2201_v13 }
  0x10   :  { %1251 = vmatpush.bf16.msra.mxu2 %v2209_v14 }
  0x11   :  { %1264 = vmatpush.bf16.msra.mxu3 %v2217_v15 }
  0x12   :  { %1226 = vmatpush.bf16.msra.mxu0 %v2192_v16 }
  0x13   :  { %1239 = vmatpush.bf16.msra.mxu1 %v2200_v17 }
  0x14   :  { %1252 = vmatpush.bf16.msra.mxu2 %v2208_v18 }
  0x15   :  { %1265 = vmatpush.bf16.msra.mxu3 %v2216_v19 }
  0x16   :  { %10 = vsyncpa [#allocation3], 0  ;;  %1227 = vmatpush.bf16.msra.mxu0 %v2191_v21  ;;  %v2190_v25 = vld [vmem:[%s2886_s1 + $0x8] sm:$0xff]  ;;  %v2189_v29 = vld [vmem:[%s2886_s1] sm:$0xff]  ;;  %vm1539_vm0 = vcmask 9216   ;;  %s1572_s29 = sshll.u32 %s2890_s5, 4  ;;  %s1573_s29 = int_to_ptr.hbm [resolvable:$true] %s1572_s29 }
  0x17   :  { %1240 = vmatpush.bf16.msra.mxu1 %v2199_v22  ;;  %v2198_v26 = vld [vmem:[%s2886_s1 + $0x48] sm:$0xff]  ;;  %v2197_v30 = vld [vmem:[%s2886_s1 + $0x40] sm:$0xff]  ;;  %v2228_v32 = vld [vmem:[%s2886_s1 + $0x138] sm:$0xff] }
  0x18   :  { %1253 = vmatpush.bf16.msra.mxu2 %v2207_v23  ;;  %v2206_v27 = vld [vmem:[%s2886_s1 + $0x88] sm:$0xff]  ;;  %v2205_v31 = vld [vmem:[%s2886_s1 + $0x80] sm:$0xff]  ;;  %v2236_v33 = vld [vmem:[%s2886_s1 + $0x178] sm:$0xff] }
  0x19   :  { %1266 = vmatpush.bf16.msra.mxu3 %v2215_v24  ;;  %v2214_v28 = vld [vmem:[%s2886_s1 + $0xc8] sm:$0xff]  ;;  %v2244_v34 = vld [vmem:[%s2886_s1 + $0x1b8] sm:$0xff]  ;;  %v2213_v35 = vld [vmem:[%s2886_s1 + $0xc0] sm:$0xff] }
  0x1a   :  { %1228 = vmatpush.bf16.msra.mxu0 %v2190_v25  ;;  %v2252_v36 = vld [vmem:[%s2886_s1 + $0x1f8] sm:$0xff]  ;;  %v318_v37 = vld [vmem:[#allocation1] sm:$0xff]  ;;  %v2227_v38 = vld [vmem:[%s2886_s1 + $0x130] sm:$0xff] }
  0x1b   :  { %1241 = vmatpush.bf16.msra.mxu1 %v2198_v26  ;;  %v320_v39 = vld [vmem:[#allocation1 + $0x12] sm:$0xff]  ;;  %v319_v42 = vld [vmem:[#allocation1 + $0x9] sm:$0xff]  ;;  %v321_v44 = vld [vmem:[#allocation1 + $0x1b] sm:$0xff] }
  0x1c   :  { %1254 = vmatpush.bf16.msra.mxu2 %v2206_v27  ;;  %v2235_v40 = vld [vmem:[%s2886_s1 + $0x170] sm:$0xff]  ;;  %v2226_v45 = vld [vmem:[%s2886_s1 + $0x128] sm:$0xff]  ;;  %v2540_v51 = vld [vmem:[#allocation1 + $0x3f] sm:$0xff] }
  0x1d   :  { %1267 = vmatpush.bf16.msra.mxu3 %v2214_v28  ;;  %v2243_v41 = vld [vmem:[%s2886_s1 + $0x1b0] sm:$0xff]  ;;  %v2234_v46 = vld [vmem:[%s2886_s1 + $0x168] sm:$0xff]  ;;  %v2225_v54 = vld [vmem:[%s2886_s1 + $0x120] sm:$0xff] }
  0x1e   :  { %1229 = vmatpush.bf16.msra.mxu0 %v2189_v29  ;;  %v2251_v43 = vld [vmem:[%s2886_s1 + $0x1f0] sm:$0xff]  ;;  %v2242_v47 = vld [vmem:[%s2886_s1 + $0x1a8] sm:$0xff]  ;;  %v2233_v55 = vld [vmem:[%s2886_s1 + $0x160] sm:$0xff] }
  0x1f   :  { %1242 = vmatpush.bf16.msra.mxu1 %v2197_v30  ;;  %v2250_v48 = vld [vmem:[%s2886_s1 + $0x1e8] sm:$0xff]  ;;  %v324_v49 = vld [vmem:[#allocation1 + $0x36] sm:$0xff]  ;;  %v2241_v56 = vld [vmem:[%s2886_s1 + $0x1a0] sm:$0xff] }
  0x20   :  { %1255 = vmatpush.bf16.msra.mxu2 %v2205_v31  ;;  %v322_v50 = vld [vmem:[#allocation1 + $0x24] sm:$0xff]  ;;  %v323_v53 = vld [vmem:[#allocation1 + $0x2d] sm:$0xff]  ;;  %v2224_v58 = vld [vmem:[%s2886_s1 + $0x118] sm:$0xff] }
  0x21   :  { %1268 = vmatpush.bf16.msra.mxu3 %v2213_v35  ;;  %1230 = vmatmul.bf16.vlgmr.msra.gmra.mxu0 %v318_v37  ;;  %v22_v52 = vld [vmem:[%s2885_s0 + $0x8] sm:$0xff]  ;;  %v2249_v57 = vld [vmem:[%s2886_s1 + $0x1e0] sm:$0xff]  ;;  %v2232_v59 = vld [vmem:[%s2886_s1 + $0x158] sm:$0xff] }
  0x22   :  { %1274 = vmatpush.bf16.msrb.mxu0 %v2228_v32  ;;  %1243 = vmatmul.bf16.vlgmr.msra.gmra.mxu1 %v319_v42  ;;  %327 = vst [vmem:[#allocation1] ss:$9 sm:$0xff] %v22_v52  ;;  %v2240_v60 = vld [vmem:[%s2886_s1 + $0x198] sm:$0xff]  ;;  %v2223_v62 = vld [vmem:[%s2886_s1 + $0x110] sm:$0xff]  ;;  %v2222_v2 = vld [vmem:[%s2886_s1 + $0x108] sm:$0xff] }
  0x23   :  { %1287 = vmatpush.bf16.msrb.mxu1 %v2236_v33  ;;  %1256 = vmatmul.bf16.vlgmr.msra.gmra.mxu2 %v320_v39  ;;  %v2248_v61 = vld [vmem:[%s2886_s1 + $0x1d8] sm:$0xff]  ;;  %v2231_v63 = vld [vmem:[%s2886_s1 + $0x150] sm:$0xff]  ;;  %v2230_v3 = vld [vmem:[%s2886_s1 + $0x148] sm:$0xff] }
  0x24   :  { %1300 = vmatpush.bf16.msrb.mxu2 %v2244_v34  ;;  %1269 = vmatmul.bf16.vlgmr.msra.gmra.mxu3 %v321_v44  ;;  %v2239_v0 = vld [vmem:[%s2886_s1 + $0x190] sm:$0xff]  ;;  %v2238_v4 = vld [vmem:[%s2886_s1 + $0x188] sm:$0xff]  ;;  %v2221_v6 = vld [vmem:[%s2886_s1 + $0x100] sm:$0xff] }
  0x25   :  { %1313 = vmatpush.bf16.msrb.mxu3 %v2252_v36  ;;  %v2247_v1 = vld [vmem:[%s2886_s1 + $0x1d0] sm:$0xff]  ;;  %v2246_v5 = vld [vmem:[%s2886_s1 + $0x1c8] sm:$0xff]  ;;  %v2229_v7 = vld [vmem:[%s2886_s1 + $0x140] sm:$0xff] }
  0x26   :  { %1275 = vmatpush.bf16.msrb.mxu0 %v2227_v38  ;;  %v2237_v8 = vld [vmem:[%s2886_s1 + $0x180] sm:$0xff]  ;;  %v2260_v9 = vld [vmem:[%s2886_s1 + $0x238] sm:$0xff]  ;;  %v2259_v14 = vld [vmem:[%s2886_s1 + $0x230] sm:$0xff] }
  0x27   :  { %1288 = vmatpush.bf16.msrb.mxu1 %v2235_v40  ;;  %v2268_v10 = vld [vmem:[%s2886_s1 + $0x278] sm:$0xff]  ;;  %v2245_v12 = vld [vmem:[%s2886_s1 + $0x1c0] sm:$0xff]  ;;  %v2267_v15 = vld [vmem:[%s2886_s1 + $0x270] sm:$0xff] }
  0x28   :  { %1301 = vmatpush.bf16.msrb.mxu2 %v2243_v41  ;;  %v2276_v11 = vld [vmem:[%s2886_s1 + $0x2b8] sm:$0xff]  ;;  %v2275_v16 = vld [vmem:[%s2886_s1 + $0x2b0] sm:$0xff]  ;;  %v2258_v18 = vld [vmem:[%s2886_s1 + $0x228] sm:$0xff] }
  0x29   :  { %1314 = vmatpush.bf16.msrb.mxu3 %v2251_v43  ;;  %v2284_v13 = vld [vmem:[%s2886_s1 + $0x2f8] sm:$0xff]  ;;  %v2283_v17 = vld [vmem:[%s2886_s1 + $0x2f0] sm:$0xff]  ;;  %v2266_v19 = vld [vmem:[%s2886_s1 + $0x268] sm:$0xff] }
  0x2a   :  { %1276 = vmatpush.bf16.msrb.mxu0 %v2226_v45  ;;  %v2274_v20 = vld [vmem:[%s2886_s1 + $0x2a8] sm:$0xff]  ;;  %v2257_v22 = vld [vmem:[%s2886_s1 + $0x220] sm:$0xff]  ;;  %v2256_v26 = vld [vmem:[%s2886_s1 + $0x218] sm:$0xff] }
  0x2b   :  { %1289 = vmatpush.bf16.msrb.mxu1 %v2234_v46  ;;  %v2282_v21 = vld [vmem:[%s2886_s1 + $0x2e8] sm:$0xff]  ;;  %v2265_v23 = vld [vmem:[%s2886_s1 + $0x260] sm:$0xff]  ;;  %v2264_v27 = vld [vmem:[%s2886_s1 + $0x258] sm:$0xff] }
  0x2c   :  { %1302 = vmatpush.bf16.msrb.mxu2 %v2242_v47  ;;  %v2273_v24 = vld [vmem:[%s2886_s1 + $0x2a0] sm:$0xff]  ;;  %v2272_v28 = vld [vmem:[%s2886_s1 + $0x298] sm:$0xff]  ;;  %v2255_v30 = vld [vmem:[%s2886_s1 + $0x210] sm:$0xff] }
  0x2d   :  { %1315 = vmatpush.bf16.msrb.mxu3 %v2250_v48  ;;  %v2281_v25 = vld [vmem:[%s2886_s1 + $0x2e0] sm:$0xff]  ;;  %v2280_v29 = vld [vmem:[%s2886_s1 + $0x2d8] sm:$0xff]  ;;  %v2263_v31 = vld [vmem:[%s2886_s1 + $0x250] sm:$0xff] }
  0x2e   :  { %1277 = vmatpush.bf16.msrb.mxu0 %v2225_v54  ;;  %v2271_v32 = vld [vmem:[%s2886_s1 + $0x290] sm:$0xff]  ;;  %v2254_v34 = vld [vmem:[%s2886_s1 + $0x208] sm:$0xff]  ;;  %v2253_v38 = vld [vmem:[%s2886_s1 + $0x200] sm:$0xff] }
  0x2f   :  { %1290 = vmatpush.bf16.msrb.mxu1 %v2233_v55  ;;  %v2279_v33 = vld [vmem:[%s2886_s1 + $0x2d0] sm:$0xff]  ;;  %v2262_v35 = vld [vmem:[%s2886_s1 + $0x248] sm:$0xff]  ;;  %v2261_v39 = vld [vmem:[%s2886_s1 + $0x240] sm:$0xff] }
  0x30   :  { %1303 = vmatpush.bf16.msrb.mxu2 %v2241_v56  ;;  %v2270_v36 = vld [vmem:[%s2886_s1 + $0x288] sm:$0xff]  ;;  %v2269_v40 = vld [vmem:[%s2886_s1 + $0x280] sm:$0xff]  ;;  %v2292_v41 = vld [vmem:[%s2886_s1 + $0x338] sm:$0xff] }
  0x31   :  { %1316 = vmatpush.bf16.msrb.mxu3 %v2249_v57  ;;  %v2278_v37 = vld [vmem:[%s2886_s1 + $0x2c8] sm:$0xff]  ;;  %v2300_v42 = vld [vmem:[%s2886_s1 + $0x378] sm:$0xff]  ;;  %v2277_v44 = vld [vmem:[%s2886_s1 + $0x2c0] sm:$0xff] }
  0x32   :  { %1278 = vmatpush.bf16.msrb.mxu0 %v2224_v58  ;;  %v2308_v43 = vld [vmem:[%s2886_s1 + $0x3b8] sm:$0xff]  ;;  %v328_v45 = vld [vmem:[#allocation1] sm:$0xff]  ;;  %v2291_v48 = vld [vmem:[%s2886_s1 + $0x330] sm:$0xff] }
  0x33   :  { %1291 = vmatpush.bf16.msrb.mxu1 %v2232_v59  ;;  %v2316_v46 = vld [vmem:[%s2886_s1 + $0x3f8] sm:$0xff]  ;;  %v2307_v52 = vld [vmem:[%s2886_s1 + $0x3b0] sm:$0xff]  ;;  %v2290_v54 = vld [vmem:[%s2886_s1 + $0x328] sm:$0xff] }
  0x34   :  { %1304 = vmatpush.bf16.msrb.mxu2 %v2240_v60  ;;  %v330_v47 = vld [vmem:[#allocation1 + $0x12] sm:$0xff]  ;;  %v2298_v55 = vld [vmem:[%s2886_s1 + $0x368] sm:$0xff]  ;;  %v2289_v58 = vld [vmem:[%s2886_s1 + $0x320] sm:$0xff] }
  0x35   :  { %1317 = vmatpush.bf16.msrb.mxu3 %v2248_v61  ;;  %v2306_v56 = vld [vmem:[%s2886_s1 + $0x3a8] sm:$0xff]  ;;  %v2297_v59 = vld [vmem:[%s2886_s1 + $0x360] sm:$0xff] }
  0x36   :  { %1279 = vmatpush.bf16.msrb.mxu0 %v2223_v62  ;;  %v2314_v57 = vld [vmem:[%s2886_s1 + $0x3e8] sm:$0xff]  ;;  %v2305_v60 = vld [vmem:[%s2886_s1 + $0x3a0] sm:$0xff]  ;;  %v2288_v62 = vld [vmem:[%s2886_s1 + $0x318] sm:$0xff] }
  0x37   :  { %1292 = vmatpush.bf16.msrb.mxu1 %v2231_v63  ;;  %v2313_v61 = vld [vmem:[%s2886_s1 + $0x3e0] sm:$0xff]  ;;  %v2296_v63 = vld [vmem:[%s2886_s1 + $0x358] sm:$0xff] }
  0x38   :  { %1305 = vmatpush.bf16.msrb.mxu2 %v2239_v0  ;;  %v2304_v0 = vld [vmem:[%s2886_s1 + $0x398] sm:$0xff] }
  0x39   :  { %1318 = vmatpush.bf16.msrb.mxu3 %v2247_v1  ;;  %v2312_v1 = vld [vmem:[%s2886_s1 + $0x3d8] sm:$0xff] }
  0x3a   :  { %1280 = vmatpush.bf16.msrb.mxu0 %v2222_v2  ;;  %v2287_v2 = vld [vmem:[%s2886_s1 + $0x310] sm:$0xff] }
  0x3b   :  { %1293 = vmatpush.bf16.msrb.mxu1 %v2230_v3  ;;  %v2295_v3 = vld [vmem:[%s2886_s1 + $0x350] sm:$0xff] }
  0x3c   :  { %1306 = vmatpush.bf16.msrb.mxu2 %v2238_v4  ;;  %v2303_v4 = vld [vmem:[%s2886_s1 + $0x390] sm:$0xff] }
  0x3d   :  { %1319 = vmatpush.bf16.msrb.mxu3 %v2246_v5  ;;  %v2311_v5 = vld [vmem:[%s2886_s1 + $0x3d0] sm:$0xff] }
  0x3e   :  { %1281 = vmatpush.bf16.msrb.mxu0 %v2221_v6  ;;  %v2286_v6 = vld [vmem:[%s2886_s1 + $0x308] sm:$0xff] }
  0x3f   :  { %1294 = vmatpush.bf16.msrb.mxu1 %v2229_v7  ;;  %v2294_v7 = vld [vmem:[%s2886_s1 + $0x348] sm:$0xff] }
  0x40   :  { %1307 = vmatpush.bf16.msrb.mxu2 %v2237_v8  ;;  %v332_v8 = vld [vmem:[#allocation1 + $0x24] sm:$0xff] }
  0x41   :  { %1320 = vmatpush.bf16.msrb.mxu3 %v2245_v12  ;;  %1282 = vmatmul.bf16.vlgmr.msrb.gmra.mxu0 %v322_v50  ;;  %v2299_v50 = vld [vmem:[%s2886_s1 + $0x370] sm:$0xff] }
  0x42   :  { %1326 = vmatpush.bf16.msra.mxu0 %v2260_v9  ;;  %1295 = vmatmul.bf16.vlgmr.msrb.gmra.mxu1 %v323_v53  ;;  %v2315_v53 = vld [vmem:[%s2886_s1 + $0x3f0] sm:$0xff] }
  0x43   :  { %1339 = vmatpush.bf16.msra.mxu1 %v2268_v10  ;;  %1308 = vmatmul.bf16.vlgmr.msrb.gmra.mxu2 %v324_v49  ;;  %v329_v49 = vld [vmem:[#allocation1 + $0x9] sm:$0xff]  ;;  %v334_v9 = vld [vmem:[#allocation1 + $0x36] sm:$0xff] }
  0x44   :  { %1352 = vmatpush.bf16.msra.mxu2 %v2276_v11  ;;  %1321 = vmatmul.bf16.vlgmr.msrb.gmra.mxu3 %v2540_v51  ;;  %v331_v51 = vld [vmem:[#allocation1 + $0x1b] sm:$0xff]  ;;  %v333_v10 = vld [vmem:[#allocation1 + $0x2d] sm:$0xff] }
  0x45   :  { %1365 = vmatpush.bf16.msra.mxu3 %v2284_v13  ;;  %v335_v11 = vld [vmem:[#allocation1 + $0x3f] sm:$0xff]  ;;  %v23_v12 = vld [vmem:[%s2885_s0 + $0x10] sm:$0x3]  ;;  %v2302_v13 = vld [vmem:[%s2886_s1 + $0x388] sm:$0xff] }
  0x46   :  { %1327 = vmatpush.bf16.msra.mxu0 %v2259_v14  ;;  %337 = vst [vmem:[#allocation1] ss:$9 sm:$0xff] %v23_v12  ;;  %v2310_v14 = vld [vmem:[%s2886_s1 + $0x3c8] sm:$0xff] }
  0x47   :  { %1340 = vmatpush.bf16.msra.mxu1 %v2267_v15  ;;  %v2285_v15 = vld [vmem:[%s2886_s1 + $0x300] sm:$0xff] }
  0x48   :  { %1353 = vmatpush.bf16.msra.mxu2 %v2275_v16  ;;  %v2293_v16 = vld [vmem:[%s2886_s1 + $0x340] sm:$0xff] }
  0x49   :  { %1366 = vmatpush.bf16.msra.mxu3 %v2283_v17  ;;  %v2324_v17 = vld [vmem:[%s2886_s1 + $0x438] sm:$0xff] }
  0x4a   :  { %1328 = vmatpush.bf16.msra.mxu0 %v2258_v18  ;;  %v2301_v18 = vld [vmem:[%s2886_s1 + $0x380] sm:$0xff] }
  0x4b   :  { %1341 = vmatpush.bf16.msra.mxu1 %v2266_v19  ;;  %v2332_v19 = vld [vmem:[%s2886_s1 + $0x478] sm:$0xff] }
  0x4c   :  { %1354 = vmatpush.bf16.msra.mxu2 %v2274_v20  ;;  %v2309_v20 = vld [vmem:[%s2886_s1 + $0x3c0] sm:$0xff] }
  0x4d   :  { %1367 = vmatpush.bf16.msra.mxu3 %v2282_v21  ;;  %v2323_v21 = vld [vmem:[%s2886_s1 + $0x430] sm:$0xff] }
  0x4e   :  { %1329 = vmatpush.bf16.msra.mxu0 %v2257_v22  ;;  %v2331_v22 = vld [vmem:[%s2886_s1 + $0x470] sm:$0xff] }
  0x4f   :  { %1342 = vmatpush.bf16.msra.mxu1 %v2265_v23  ;;  %v2322_v23 = vld [vmem:[%s2886_s1 + $0x428] sm:$0xff] }
  0x50   :  { %1355 = vmatpush.bf16.msra.mxu2 %v2273_v24  ;;  %v2330_v24 = vld [vmem:[%s2886_s1 + $0x468] sm:$0xff] }
  0x51   :  { %1368 = vmatpush.bf16.msra.mxu3 %v2281_v25  ;;  %v2321_v25 = vld [vmem:[%s2886_s1 + $0x420] sm:$0xff] }
  0x52   :  { %1330 = vmatpush.bf16.msra.mxu0 %v2256_v26  ;;  %v2329_v26 = vld [vmem:[%s2886_s1 + $0x460] sm:$0xff] }
  0x53   :  { %1343 = vmatpush.bf16.msra.mxu1 %v2264_v27  ;;  %v2320_v27 = vld [vmem:[%s2886_s1 + $0x418] sm:$0xff] }
  0x54   :  { %1356 = vmatpush.bf16.msra.mxu2 %v2272_v28  ;;  %v2328_v28 = vld [vmem:[%s2886_s1 + $0x458] sm:$0xff] }
  0x55   :  { %1369 = vmatpush.bf16.msra.mxu3 %v2280_v29  ;;  %v2319_v29 = vld [vmem:[%s2886_s1 + $0x410] sm:$0xff] }
  0x56   :  { %1331 = vmatpush.bf16.msra.mxu0 %v2255_v30  ;;  %v2327_v30 = vld [vmem:[%s2886_s1 + $0x450] sm:$0xff] }
  0x57   :  { %1344 = vmatpush.bf16.msra.mxu1 %v2263_v31  ;;  %v2318_v31 = vld [vmem:[%s2886_s1 + $0x408] sm:$0xff] }
  0x58   :  { %1357 = vmatpush.bf16.msra.mxu2 %v2271_v32  ;;  %v2326_v32 = vld [vmem:[%s2886_s1 + $0x448] sm:$0xff] }
  0x59   :  { %1370 = vmatpush.bf16.msra.mxu3 %v2279_v33  ;;  %v2317_v33 = vld [vmem:[%s2886_s1 + $0x400] sm:$0xff] }
  0x5a   :  { %1332 = vmatpush.bf16.msra.mxu0 %v2254_v34  ;;  %v2325_v34 = vld [vmem:[%s2886_s1 + $0x440] sm:$0xff] }
  0x5b   :  { %1345 = vmatpush.bf16.msra.mxu1 %v2262_v35  ;;  %v338_v35 = vld [vmem:[#allocation1] sm:$0xff] }
  0x5c   :  { %1358 = vmatpush.bf16.msra.mxu2 %v2270_v36  ;;  %v339_v36 = vld [vmem:[#allocation1 + $0x9] sm:$0xff] }
  0x5d   :  { %1371 = vmatpush.bf16.msra.mxu3 %v2278_v37  ;;  %v2342_v37 = vld [vmem:[%s2887_s2] ss:$0 sm:$0xff] }
  0x5e   :  { %1333 = vmatpush.bf16.msra.mxu0 %v2253_v38 }
  0x5f   :  { %1346 = vmatpush.bf16.msra.mxu1 %v2261_v39 }
  0x60   :  { %1359 = vmatpush.bf16.msra.mxu2 %v2269_v40 }
  0x61   :  { %1372 = vmatpush.bf16.msra.mxu3 %v2277_v44  ;;  %1334 = vmatmul.bf16.vlgmr.msra.gmra.mxu0 %v328_v45 }
  0x62   :  { %1378 = vmatpush.bf16.msrb.mxu0 %v2292_v41  ;;  %1347 = vmatmul.bf16.vlgmr.msra.gmra.mxu1 %v329_v49 }
  0x63   :  { %1391 = vmatpush.bf16.msrb.mxu1 %v2300_v42  ;;  %1360 = vmatmul.bf16.vlgmr.msra.gmra.mxu2 %v330_v47 }
  0x64   :  { %1404 = vmatpush.bf16.msrb.mxu2 %v2308_v43  ;;  %1373 = vmatmul.bf16.vlgmr.msra.gmra.mxu3 %v331_v51 }
  0x65   :  { %1417 = vmatpush.bf16.msrb.mxu3 %v2316_v46 }
  0x66   :  { %1379 = vmatpush.bf16.msrb.mxu0 %v2291_v48 }
  0x67   :  { %1392 = vmatpush.bf16.msrb.mxu1 %v2299_v50 }
  0x68   :  { %1405 = vmatpush.bf16.msrb.mxu2 %v2307_v52 }
  0x69   :  { %1418 = vmatpush.bf16.msrb.mxu3 %v2315_v53 }
  0x6a   :  { %1380 = vmatpush.bf16.msrb.mxu0 %v2290_v54 }
  0x6b   :  { %1393 = vmatpush.bf16.msrb.mxu1 %v2298_v55 }
  0x6c   :  { %1406 = vmatpush.bf16.msrb.mxu2 %v2306_v56 }
  0x6d   :  { %1419 = vmatpush.bf16.msrb.mxu3 %v2314_v57 }
  0x6e   :  { %1381 = vmatpush.bf16.msrb.mxu0 %v2289_v58 }
  0x6f   :  { %1394 = vmatpush.bf16.msrb.mxu1 %v2297_v59 }
  0x70   :  { %1407 = vmatpush.bf16.msrb.mxu2 %v2305_v60  ;;  %v2340_v60 = vld [vmem:[%s2888_s3 + $0x38] sm:$0xff] }
  0x71   :  { %1420 = vmatpush.bf16.msrb.mxu3 %v2313_v61 }
  0x72   :  { %1382 = vmatpush.bf16.msrb.mxu0 %v2288_v62 }
  0x73   :  { %1395 = vmatpush.bf16.msrb.mxu1 %v2296_v63  ;;  %v2339_v63 = vld [vmem:[%s2888_s3 + $0x30] sm:$0xff] }
  0x74   :  { %1408 = vmatpush.bf16.msrb.mxu2 %v2304_v0 }
  0x75   :  { %1421 = vmatpush.bf16.msrb.mxu3 %v2312_v1 }
  0x76   :  { %1383 = vmatpush.bf16.msrb.mxu0 %v2287_v2  ;;  %v2338_v2 = vld [vmem:[%s2888_s3 + $0x28] sm:$0xff] }
  0x77   :  { %1396 = vmatpush.bf16.msrb.mxu1 %v2295_v3  ;;  %v2337_v3 = vld [vmem:[%s2888_s3 + $0x20] sm:$0xff] }
  0x78   :  { %1409 = vmatpush.bf16.msrb.mxu2 %v2303_v4 }
  0x79   :  { %1422 = vmatpush.bf16.msrb.mxu3 %v2311_v5 }
  0x7a   :  { %1384 = vmatpush.bf16.msrb.mxu0 %v2286_v6  ;;  %v2336_v6 = vld [vmem:[%s2888_s3 + $0x18] sm:$0xff] }
  0x7b   :  { %1397 = vmatpush.bf16.msrb.mxu1 %v2294_v7 }
  0x7c   :  { %1410 = vmatpush.bf16.msrb.mxu2 %v2302_v13 }
  0x7d   :  { %1423 = vmatpush.bf16.msrb.mxu3 %v2310_v14  ;;  %v2333_v14 = vld [vmem:[%s2888_s3] sm:$0xff] }
  0x7e   :  { %1385 = vmatpush.bf16.msrb.mxu0 %v2285_v15 }
  0x7f   :  { %1398 = vmatpush.bf16.msrb.mxu1 %v2293_v16 }
  0x80   :  { %1411 = vmatpush.bf16.msrb.mxu2 %v2301_v18 }
  0x81   :  { %1424 = vmatpush.bf16.msrb.mxu3 %v2309_v20  ;;  %1386 = vmatmul.bf16.vlgmr.msrb.gmra.mxu0 %v332_v8  ;;  %v2335_v8 = vld [vmem:[%s2888_s3 + $0x10] sm:$0xff] }
  0x82   :  { %1430 = vmatpush.bf16.msra.mxu0 %v2324_v17  ;;  %1399 = vmatmul.bf16.vlgmr.msrb.gmra.mxu1 %v333_v10  ;;  %v2334_v10 = vld [vmem:[%s2888_s3 + $0x8] sm:$0xff] }
  0x83   :  { %1443 = vmatpush.bf16.msra.mxu1 %v2332_v19  ;;  %1412 = vmatmul.bf16.vlgmr.msrb.gmra.mxu2 %v334_v9 }
  0x84   :  { %1425 = vmatmul.bf16.vlgmr.msrb.gmra.mxu3 %v335_v11  ;;  %1526 = vmatpush.bf16.msra.mxu2 %v2340_v60 }
  0x86   :  { %1431 = vmatpush.bf16.msra.mxu0 %v2323_v21 }
  0x87   :  { %1444 = vmatpush.bf16.msra.mxu1 %v2331_v22 }
  0x88   :  { %1527 = vmatpush.bf16.msra.mxu2 %v2339_v63 }
  0x8a   :  { %1432 = vmatpush.bf16.msra.mxu0 %v2322_v23 }
  0x8b   :  { %1445 = vmatpush.bf16.msra.mxu1 %v2330_v24 }
  0x8c   :  { %1528 = vmatpush.bf16.msra.mxu2 %v2338_v2 }
  0x8e   :  { %1433 = vmatpush.bf16.msra.mxu0 %v2321_v25 }
  0x8f   :  { %1446 = vmatpush.bf16.msra.mxu1 %v2329_v26 }
  0x90   :  { %1529 = vmatpush.bf16.msra.mxu2 %v2337_v3 }
  0x92   :  { %1434 = vmatpush.bf16.msra.mxu0 %v2320_v27 }
  0x93   :  { %1447 = vmatpush.bf16.msra.mxu1 %v2328_v28 }
  0x94   :  { %1530 = vmatpush.bf16.msra.mxu2 %v2336_v6 }
  0x96   :  { %1435 = vmatpush.bf16.msra.mxu0 %v2319_v29 }
  0x97   :  { %1448 = vmatpush.bf16.msra.mxu1 %v2327_v30 }
  0x98   :  { %1531 = vmatpush.bf16.msra.mxu2 %v2335_v8 }
  0x9a   :  { %1436 = vmatpush.bf16.msra.mxu0 %v2318_v31 }
  0x9b   :  { %1449 = vmatpush.bf16.msra.mxu1 %v2326_v32 }
  0x9c   :  { %1532 = vmatpush.bf16.msra.mxu2 %v2334_v10 }
  0x9e   :  { %1437 = vmatpush.bf16.msra.mxu0 %v2317_v33  ;;  %v1231_v38 = vpop.f32.mrf.mxu0 }
  0x9f   :  { %1450 = vmatpush.bf16.msra.mxu1 %v2325_v34  ;;  %v1232_v39 = vadd.f32 %v2342_v37, %v1231_v38  ;;  %v1244_v40 = vpop.f32.mrf.mxu1  ;;  %v2343_v38 = vld [vmem:[%s2889_s4] ss:$0 sm:$0xff]  ;;  %s2374_s4 = smov [#allocation2]  }
  0xa0   :  { %1533 = vmatpush.bf16.msra.mxu2 %v2333_v14  ;;  %s1570_s26 = sshll.u32 %s2374_s4, 4  ;;  %s1571_s26 = int_to_ptr.vmem [resolvable:$true] %s1570_s26 }
  0xa1   :  { %1438 = vmatmul.bf16.vlgmr.msra.gmra.mxu0 %v338_v35  ;;  %v1245_v41 = vadd.f32 %v1244_v40, %v1232_v39 }
  0xa2   :  { %1451 = vmatmul.bf16.vlgmr.msra.gmra.mxu1 %v339_v36 }
  0xa6   :  { %v1257_v42 = vpop.f32.mrf.mxu2  ;;  %v1233_v44 = vpop.f32.mrf.mxu0 }
  0xa7   :  { %v1258_v43 = vadd.f32 %v1257_v42, %v1245_v41  ;;  %v1270_v45 = vpop.f32.mrf.mxu3  ;;  %v1246_v46 = vpop.f32.mrf.mxu1 }
  0xa9   :  { %v1271_v47 = vadd.f32 %v1270_v45, %v1258_v43 }
  0xae   :  { %v1259_v48 = vpop.f32.mrf.mxu2 }
  0xaf   :  { %v1272_v49 = vpop.f32.mrf.mxu3 }
  0xbe   :  { %v1283_v50 = vpop.f32.mrf.mxu0 }
  0xbf   :  { %v1296_v51 = vpop.f32.mrf.mxu1  ;;  %v1284_v7 = vadd.f32 %v1283_v50, %v1271_v47 }
  0xc1   :  { %v1297_v9 = vadd.f32 %v1296_v51, %v1284_v7 }
  0xc6   :  { %v1309_v52 = vpop.f32.mrf.mxu2  ;;  %v1285_v54 = vpop.f32.mrf.mxu0 }
  0xc7   :  { %v1322_v53 = vpop.f32.mrf.mxu3  ;;  %v1298_v55 = vpop.f32.mrf.mxu1  ;;  %v1310_v11 = vadd.f32 %v1309_v52, %v1297_v9 }
  0xc9   :  { %v1323_v15 = vadd.f32 %v1322_v53, %v1310_v11 }
  0xce   :  { %v1311_v56 = vpop.f32.mrf.mxu2 }
  0xcf   :  { %v1324_v57 = vpop.f32.mrf.mxu3 }
  0xde   :  { %v1335_v58 = vpop.f32.mrf.mxu0 }
  0xdf   :  { %v1348_v59 = vpop.f32.mrf.mxu1  ;;  %v1336_v16 = vadd.f32 %v1335_v58, %v1323_v15 }
  0xe1   :  { %v1349_v21 = vadd.f32 %v1348_v59, %v1336_v16 }
  0xe6   :  { %v1361_v61 = vpop.f32.mrf.mxu2  ;;  %v1337_v62 = vpop.f32.mrf.mxu0 }
  0xe7   :  { %v1374_v0 = vpop.f32.mrf.mxu3  ;;  %v1350_v1 = vpop.f32.mrf.mxu1  ;;  %v1362_v22 = vadd.f32 %v1361_v61, %v1349_v21 }
  0xe9   :  { %v1375_v23 = vadd.f32 %v1374_v0, %v1362_v22 }
  0xee   :  { %v1363_v4 = vpop.f32.mrf.mxu2 }
  0xef   :  { %v1376_v5 = vpop.f32.mrf.mxu3 }
  0xfe   :  { %v1387_v12 = vpop.f32.mrf.mxu0 }
  0xff   :  { %v1400_v13 = vpop.f32.mrf.mxu1  ;;  %v1388_v26 = vadd.f32 %v1387_v12, %v1375_v23 }
 0x101   :  { %v1401_v27 = vadd.f32 %v1400_v13, %v1388_v26 }
 0x106   :  { %v1413_v17 = vpop.f32.mrf.mxu2  ;;  %v1389_v18 = vpop.f32.mrf.mxu0 }
 0x107   :  { %v1426_v19 = vpop.f32.mrf.mxu3  ;;  %v1402_v20 = vpop.f32.mrf.mxu1  ;;  %v1414_v28 = vadd.f32 %v1413_v17, %v1401_v27 }
 0x109   :  { %v1427_v29 = vadd.f32 %v1426_v19, %v1414_v28 }
 0x10e   :  { %v1415_v24 = vpop.f32.mrf.mxu2 }
 0x10f   :  { %v1428_v25 = vpop.f32.mrf.mxu3 }
 0x11e   :  { %v1439_v30 = vpop.f32.mrf.mxu0 }
 0x11f   :  { %v1440_v31 = vadd.f32 %v1439_v30, %v1427_v29  ;;  %v1452_v32 = vpop.f32.mrf.mxu1 }
 0x121   :  { %v1453_v33 = vadd.f32 %v1452_v32, %v1440_v31 }
 0x123   :  { %v1456_v34 = vmax.f32 %v1453_v33, 0.0 }
 0x125   :  { %v1457_v35 = vpack.c.bf16 %v1456_v34, %v1456_v34 }
 0x126   :  { %v1441_v36 = vpop.f32.mrf.mxu0 }
 0x127   :  { %v1454_v37 = vpop.f32.mrf.mxu1  ;;  %1534 = vmatmul.bf16.vlgmr.msra.gmra.mxu2 %v1457_v35 }
 0x1aa   :  { %v1535_v39 = vpop.f32.mrf.mxu2 }
 0x1ab   :  { %v1536_v40 = vadd.f32 %v2343_v38, %v1535_v39 }
 0x1ad   :  { %v1540_v41 = vsel %vm1539_vm0, %v1536_v40, -inf }
 0x1ae   :  { %1541 = vmax.xlane.f32.xlu0 %v1540_v41 }
 0x1b2   :  { %v1537_v42 = vpop.f32.mrf.mxu2 }
 0x221   :  { %v1542_v43 = vpop.xlane.xlu0 %1541 }
 0x222   :  { %v1543_v44 = vsub.f32 %v1536_v40, %v1542_v43 }
 0x224   :  { %v1544_v45 = vmul.f32 1.442695, %v1543_v44 }
 0x226   :  { %2344 = vpow2.f32 %v1544_v45 }
 0x22c   :  { %v2345_v46 = vpop.eup %2344 }
 0x22d   :  { %v1546_v47 = vsel %vm1539_vm0, %v2345_v46, 0.0 }
 0x22e   :  { %1547 = vadd.xlane.f32.xlu0 %v1546_v47 }
 0x2a1   :  { %v1548_v48 = vpop.xlane.xlu0 %1547 }
 0x2a2   :  { %2346 = vrcp.f32 %v1548_v48  ;;  %v1560_v52 = vand.u32 2147483648, %v1548_v48  ;;  %v1558_v54 = vand.u32 2147483647, %v1548_v48  ;;  %vm1554_vm2 = vweird.f32 %v1548_v48 }
 0x2a4   :  { %v1561_v56 = vor.u32 1.1754944e-38, %v1560_v52  ;;  %vm1559_vm4 = vcmp.eq.f32.partialorder %v1558_v54, 8.507059e+37 }
 0x2a8   :  { %v2347_v49 = vpop.eup %2346 }
 0x2a9   :  { %v1550_v50 = vmul.f32 %v2347_v49, %v1548_v48  ;;  %vm1555_vm1 = vweird.f32 %v2347_v49 }
 0x2aa   :  { %vm1556_vm3 = vmor %vm1554_vm2, %vm1555_vm1 }
 0x2ab   :  { %v1551_v51 = vsub.f32 1.0, %v1550_v50 }
 0x2ad   :  { %v1552_v53 = vmul.f32 %v2347_v49, %v1551_v51 }
 0x2af   :  { %v1553_v55 = vadd.f32 %v2347_v49, %v1552_v53 }
 0x2b1   :  { %v1557_v57 = vsel %vm1556_vm3, %v2347_v49, %v1553_v55 }
 0x2b2   :  { %v1562_v58 = vsel %vm1559_vm4, %v1561_v56, %v1557_v57 }
 0x2b3   :  { %v1563_v59 = vmul.f32 %v2345_v46, %v1562_v58 }
 0x2b5   :  { %1564 = vst.msk [vmem:[#allocation2] sm:$0x3] %vm1539_vm0, %v1563_v59 }
 0x2b6   :  { %1575 = dma.vmem_to_hbm [thread:$0]  %s1571_s26, 32, %s1573_s29, [#allocation3]  }
 0x2b7   :  { %2372 = dma.done.wait [#allocation3], 32  }
 0x2b8   :  { %2373 = vsyncadd [#allocation3], 4294967264 }
 0x2b9   :  { %1580 = vsyncpa [#allocation3], 1 }

</bundles_post_ra>
